<compile_context>
chip_gen: v6e
topology: v6e:2x2x1
jax: 0.10.0
libtpu: 0.0.40
codegen_flags: <defaults>
</compile_context>

<pallas_src>
import math
import numpy as np
import jax
import jax.numpy as jnp
from jax.experimental import pallas as pl
from jax.experimental.pallas import tpu as pltpu

# ----------------------------- configuration -------------------------------
B = 8          # batch size
D = 128        # latent dim (lane-aligned)
T = 5          # number of diffusion steps (T-1 p-nets + decoder)
BETA_LO, BETA_HI = 1e-4, 0.02

# torch.linspace(betas[0], betas[1], T)
BETAS = [BETA_LO + (BETA_HI - BETA_LO) * t / (T - 1) for t in range(T)]
ALPHAS = [1.0 - b for b in BETAS]
SQRT_ALPHA = [math.sqrt(a) for a in ALPHAS]
SQRT_BETA = [math.sqrt(b) for b in BETAS]
LOG2PI = math.log(2.0 * math.pi)

# term_q variable part:  -(z - sqrt(a)*z)^2 / (2 b)  ==  -C_Q[i] * z^2
C_Q = [(1.0 - math.sqrt(a)) ** 2 / (2.0 * b) for a, b in zip(ALPHAS, BETAS)]
# All element-wise constants, folded at trace time:
#   from -mean(L_0):    +0.5 * D * log(2*pi)
#   from sum_i term_q:  -0.5 * B * D * sum_i log(beta_i)
LOSS_CONST = 0.5 * D * LOG2PI - 0.5 * B * D * sum(math.log(b) for b in BETAS)
INV_2B = 1.0 / (2.0 * B)   # folds mean over batch of L_0 into the accumulator


# ------------------------------- kernel ------------------------------------
def diffusion_loss_kernel(x_ref, eps_ref, bp_ref, bdec_ref, wp_hbm, wdec_hbm,
                          o_ref, wp_buf, wdec_buf, sem):
    # ---- kick off weight DMAs (HBM bf16 -> VMEM), in consumption order -----
    for n in range(T - 2, -1, -1):        # p-net T-2 is consumed first
        pltpu.make_async_copy(wp_hbm.at[n], wp_buf.at[n], sem.at[n]).start()
    pltpu.make_async_copy(wdec_hbm, wdec_buf, sem.at[T - 1]).start()

    x = x_ref[...]                        # [B, D] f32

    # ---- q_process: z_t = z_{t-1}*sqrt(alpha_t) + sqrt(beta_t)*eps_t --------
    # (no weights needed -> overlaps the weight DMAs above)
    zs = []
    z = x
    for t in range(T):
        z = z * SQRT_ALPHA[t] + SQRT_BETA[t] * eps_ref[t]
        zs.append(z)

    # ---- fused per-element loss accumulator ---------------------------------
    # prior step (i = T-1, mu = 0, logvar = 0): term_q - term_p varies as
    # (0.5 - C_{T-1}) * z^2  (constants folded into LOSS_CONST)
    acc = (0.5 - C_Q[T - 1]) * zs[T - 1] * zs[T - 1]

    # p-net steps (KL index i = 0 .. T-2): net T-2-i applied to zs[i+1],
    # compared against sample zs[i]  (matches reversed mus of the module).
    for i in range(T - 1):
        n = T - 2 - i
        pltpu.make_async_copy(wp_hbm.at[n], wp_buf.at[n], sem.at[n]).wait()
        w = wp_buf[n].astype(jnp.float32)                 # [D, 2D]
        b = bp_ref[pl.ds(n, 1), :]                        # [1, 2D] (stays 2-D)
        h = jnp.dot(zs[i + 1], w,
                    preferred_element_type=jnp.float32) + b
        mu = h[:, :D]
        lv = h[:, D:]
        d = zs[i] - mu
        # term_q - term_p  (variable part, -0.5*log(2*pi) cancelled):
        #   -C_i*z^2 + 0.5*(z-mu)^2*exp(-lv) + 0.5*lv
        acc = acc + (0.5 * d * d) * jnp.exp(-lv) + 0.5 * lv \
                  - C_Q[i] * (zs[i] * zs[i])

    # ---- reconstruction term, with the 1/B batch-mean folded in -------------
    pltpu.make_async_copy(wdec_hbm, wdec_buf, sem.at[T - 1]).wait()
    wd = wdec_buf[...].astype(jnp.float32)                # [D, D]
    x0 = jnp.dot(zs[0], wd, preferred_element_type=jnp.float32) + bdec_ref[...]
    diff = x - x0
    acc = acc + (diff * diff) * INV_2B

    # ---- one cross-lane reduction + trace-time constant ---------------------
    o_ref[0, 0] = jnp.sum(acc) + LOSS_CONST


# ------------------------------ wrapper -------------------------------------
def diffusion_loss(x, eps, b_p, b_dec, w_p_bf16, w_dec_bf16):
    vmem = pl.BlockSpec(memory_space=pltpu.MemorySpace.VMEM)
    hbm = pl.BlockSpec(memory_space=pl.ANY)      # manual DMA for the weights
    out = pl.pallas_call(
        diffusion_loss_kernel,
        out_shape=jax.ShapeDtypeStruct((1, 1), jnp.float32),
        in_specs=[vmem, vmem, vmem, vmem, hbm, hbm],
        out_specs=pl.BlockSpec(memory_space=pltpu.MemorySpace.SMEM),
        scratch_shapes=[
            pltpu.VMEM((T - 1, D, 2 * D), jnp.bfloat16),   # p-net weights
            pltpu.VMEM((D, D), jnp.bfloat16),              # decoder weight
            pltpu.SemaphoreType.DMA((T,)),                 # T-1 p-nets + dec
        ],
    )(x, eps, b_p, b_dec, w_p_bf16, w_dec_bf16)
    return out[0, 0]


# --------------------------- pure-JAX reference ------------------------------
def diffusion_loss_ref(x, eps, w_p, b_p, w_dec, b_dec):
    zs = []
    z = x
    for t in range(T):
        z = z * SQRT_ALPHA[t] + SQRT_BETA[t] * eps[t]
        zs.append(z)
    mus, log_vars = [], []
    for j in range(T - 1):
        net_idx = T - 2 - j
        h = zs[j + 1] @ w_p[net_idx] + b_p[net_idx][None, :]
        mus.append(h[:, :D])
        log_vars.append(h[:, D:])
    x0 = zs[0] @ w_dec + b_dec

    def log_norm(v, mu, logvar):
        var = jnp.exp(logvar)
        return -0.5 * LOG2PI - (v - mu) ** 2 / (2.0 * var) - 0.5 * logvar

    L0 = jnp.sum(log_norm(x - x0, 0.0, 0.0), axis=-1)
    kl = 0.0
    for i in range(T):
        tq = log_norm(zs[i], math.sqrt(ALPHAS[i]) * zs[i],
                      jnp.float32(math.log(BETAS[i])))
        if i == T - 1:
            tp = log_norm(zs[i], 0.0, 0.0)
        else:
            tp = log_norm(zs[i], mus[i], log_vars[i])
        kl = kl + jnp.sum(tq - tp)
    return -(jnp.mean(L0) - kl)


# -------------------------------- main ---------------------------------------
if __name__ == "__main__":
    key = jax.random.PRNGKey(0)
    kx, ke, kw1, kb1, kw2, kb2 = jax.random.split(key, 6)

    x = jax.random.normal(kx, (B, D), dtype=jnp.float32)
    # TODO(synk): torch.randn_like RNG stream not reproducible; noise drawn in JAX.
    eps = jax.random.normal(ke, (T, B, D), dtype=jnp.float32)

    # p-nets: Linear(D -> 2D), decoder: Linear(D -> D), deterministic init.
    w_p_f32 = 0.05 * jax.random.normal(kw1, (T - 1, D, 2 * D), dtype=jnp.float32)
    b_p = 0.05 * jax.random.normal(kb1, (T - 1, 2 * D), dtype=jnp.float32)
    w_dec_f32 = 0.05 * jax.random.normal(kw2, (D, D), dtype=jnp.float32)
    b_dec = 0.05 * jax.random.normal(kb2, (1, D), dtype=jnp.float32)

    # Weights stored in HBM as bf16 (halves dominant DMA traffic); reference
    # uses the same bf16-quantized values upcast to f32 so the comparison is
    # apples-to-apples and the f32 matmul keeps the tight tolerance.
    w_p = w_p_f32.astype(jnp.bfloat16)
    w_dec = w_dec_f32.astype(jnp.bfloat16)

    loss = jax.block_until_ready(
        jax.jit(diffusion_loss)(x, eps, b_p, b_dec, w_p, w_dec))
    loss_ref = jax.block_until_ready(
        diffusion_loss_ref(x, eps, w_p.astype(jnp.float32), b_p,
                           w_dec.astype(jnp.float32), b_dec))

    np.testing.assert_allclose(np.asarray(loss), np.asarray(loss_ref),
                               rtol=1e-4, atol=1e-3)
    print("KERNEL_OK")
</pallas_src>

<mosaic_0001>
module attributes {stable_mosaic.version = 11 : i64} {
  func.func @diffusion_loss_kernel(%arg0: memref<8x128xf32, #tpu.memory_space<vmem>>, %arg1: memref<5x8x128xf32, #tpu.memory_space<vmem>>, %arg2: memref<4x256xf32, #tpu.memory_space<vmem>>, %arg3: memref<1x128xf32, #tpu.memory_space<vmem>>, %arg4: memref<4x128x256xbf16, #tpu.memory_space<any>>, %arg5: memref<128x128xbf16, #tpu.memory_space<any>>, %arg6: memref<1x1xf32, #tpu.memory_space<smem>>, %arg7: memref<4x128x256xbf16, #tpu.memory_space<vmem>>, %arg8: memref<128x128xbf16, #tpu.memory_space<vmem>>, %arg9: memref<5x!tpu.dma_semaphore, #tpu.memory_space<semaphore_mem>>) attributes {dimension_semantics = [], scalar_prefetch = 0 : i64, scratch_operands = 3 : i64, tpu.core_type = #tpu.core_type<tc>} {
    %c3_i32 = arith.constant 3 : i32
    %c3_i32_0 = arith.constant 3 : i32
    %c3_i32_1 = arith.constant 3 : i32
    %c0_i32 = arith.constant 0 : i32
    %c0_i32_2 = arith.constant 0 : i32
    %0 = tpu.memref_slice %arg4[%c3_i32, %c0_i32, %c0_i32_2] : memref<4x128x256xbf16, #tpu.memory_space<any>> -> memref<1x128x256xbf16, #tpu.memory_space<any>>
    %1 = tpu.memref_squeeze %0 : memref<1x128x256xbf16, #tpu.memory_space<any>> -> memref<128x256xbf16, #tpu.memory_space<any>>
    %c0_i32_3 = arith.constant 0 : i32
    %c0_i32_4 = arith.constant 0 : i32
    %2 = tpu.memref_slice %arg7[%c3_i32_0, %c0_i32_3, %c0_i32_4] : memref<4x128x256xbf16, #tpu.memory_space<vmem>> -> memref<1x128x256xbf16, #tpu.memory_space<vmem>>
    %3 = tpu.memref_squeeze %2 : memref<1x128x256xbf16, #tpu.memory_space<vmem>> -> memref<128x256xbf16, #tpu.memory_space<vmem>>
    %4 = tpu.memref_slice %arg9[%c3_i32_1] : memref<5x!tpu.dma_semaphore, #tpu.memory_space<semaphore_mem>> -> memref<1x!tpu.dma_semaphore, #tpu.memory_space<semaphore_mem>>
    %5 = tpu.memref_squeeze %4 : memref<1x!tpu.dma_semaphore, #tpu.memory_space<semaphore_mem>> -> memref<!tpu.dma_semaphore, #tpu.memory_space<semaphore_mem>>
    tpu.enqueue_dma source(%1 : memref<128x256xbf16, #tpu.memory_space<any>>) target(%3 : memref<128x256xbf16, #tpu.memory_space<vmem>>) target_semaphore(%5 : memref<!tpu.dma_semaphore, #tpu.memory_space<semaphore_mem>>)
    %c2_i32 = arith.constant 2 : i32
    %c2_i32_5 = arith.constant 2 : i32
    %c2_i32_6 = arith.constant 2 : i32
    %c0_i32_7 = arith.constant 0 : i32
    %c0_i32_8 = arith.constant 0 : i32
    %6 = tpu.memref_slice %arg4[%c2_i32, %c0_i32_7, %c0_i32_8] : memref<4x128x256xbf16, #tpu.memory_space<any>> -> memref<1x128x256xbf16, #tpu.memory_space<any>>
    %7 = tpu.memref_squeeze %6 : memref<1x128x256xbf16, #tpu.memory_space<any>> -> memref<128x256xbf16, #tpu.memory_space<any>>
    %c0_i32_9 = arith.constant 0 : i32
    %c0_i32_10 = arith.constant 0 : i32
    %8 = tpu.memref_slice %arg7[%c2_i32_5, %c0_i32_9, %c0_i32_10] : memref<4x128x256xbf16, #tpu.memory_space<vmem>> -> memref<1x128x256xbf16, #tpu.memory_space<vmem>>
    %9 = tpu.memref_squeeze %8 : memref<1x128x256xbf16, #tpu.memory_space<vmem>> -> memref<128x256xbf16, #tpu.memory_space<vmem>>
    %10 = tpu.memref_slice %arg9[%c2_i32_6] : memref<5x!tpu.dma_semaphore, #tpu.memory_space<semaphore_mem>> -> memref<1x!tpu.dma_semaphore, #tpu.memory_space<semaphore_mem>>
    %11 = tpu.memref_squeeze %10 : memref<1x!tpu.dma_semaphore, #tpu.memory_space<semaphore_mem>> -> memref<!tpu.dma_semaphore, #tpu.memory_space<semaphore_mem>>
    tpu.enqueue_dma source(%7 : memref<128x256xbf16, #tpu.memory_space<any>>) target(%9 : memref<128x256xbf16, #tpu.memory_space<vmem>>) target_semaphore(%11 : memref<!tpu.dma_semaphore, #tpu.memory_space<semaphore_mem>>)
    %c1_i32 = arith.constant 1 : i32
    %c1_i32_11 = arith.constant 1 : i32
    %c1_i32_12 = arith.constant 1 : i32
    %c0_i32_13 = arith.constant 0 : i32
    %c0_i32_14 = arith.constant 0 : i32
    %12 = tpu.memref_slice %arg4[%c1_i32, %c0_i32_13, %c0_i32_14] : memref<4x128x256xbf16, #tpu.memory_space<any>> -> memref<1x128x256xbf16, #tpu.memory_space<any>>
    %13 = tpu.memref_squeeze %12 : memref<1x128x256xbf16, #tpu.memory_space<any>> -> memref<128x256xbf16, #tpu.memory_space<any>>
    %c0_i32_15 = arith.constant 0 : i32
    %c0_i32_16 = arith.constant 0 : i32
    %14 = tpu.memref_slice %arg7[%c1_i32_11, %c0_i32_15, %c0_i32_16] : memref<4x128x256xbf16, #tpu.memory_space<vmem>> -> memref<1x128x256xbf16, #tpu.memory_space<vmem>>
    %15 = tpu.memref_squeeze %14 : memref<1x128x256xbf16, #tpu.memory_space<vmem>> -> memref<128x256xbf16, #tpu.memory_space<vmem>>
    %16 = tpu.memref_slice %arg9[%c1_i32_12] : memref<5x!tpu.dma_semaphore, #tpu.memory_space<semaphore_mem>> -> memref<1x!tpu.dma_semaphore, #tpu.memory_space<semaphore_mem>>
    %17 = tpu.memref_squeeze %16 : memref<1x!tpu.dma_semaphore, #tpu.memory_space<semaphore_mem>> -> memref<!tpu.dma_semaphore, #tpu.memory_space<semaphore_mem>>
    tpu.enqueue_dma source(%13 : memref<128x256xbf16, #tpu.memory_space<any>>) target(%15 : memref<128x256xbf16, #tpu.memory_space<vmem>>) target_semaphore(%17 : memref<!tpu.dma_semaphore, #tpu.memory_space<semaphore_mem>>)
    %c0_i32_17 = arith.constant 0 : i32
    %c0_i32_18 = arith.constant 0 : i32
    %c0_i32_19 = arith.constant 0 : i32
    %c0_i32_20 = arith.constant 0 : i32
    %c0_i32_21 = arith.constant 0 : i32
    %18 = tpu.memref_slice %arg4[%c0_i32_17, %c0_i32_20, %c0_i32_21] : memref<4x128x256xbf16, #tpu.memory_space<any>> -> memref<1x128x256xbf16, #tpu.memory_space<any>>
    %19 = tpu.memref_squeeze %18 : memref<1x128x256xbf16, #tpu.memory_space<any>> -> memref<128x256xbf16, #tpu.memory_space<any>>
    %c0_i32_22 = arith.constant 0 : i32
    %c0_i32_23 = arith.constant 0 : i32
    %20 = tpu.memref_slice %arg7[%c0_i32_18, %c0_i32_22, %c0_i32_23] : memref<4x128x256xbf16, #tpu.memory_space<vmem>> -> memref<1x128x256xbf16, #tpu.memory_space<vmem>>
    %21 = tpu.memref_squeeze %20 : memref<1x128x256xbf16, #tpu.memory_space<vmem>> -> memref<128x256xbf16, #tpu.memory_space<vmem>>
    %22 = tpu.memref_slice %arg9[%c0_i32_19] : memref<5x!tpu.dma_semaphore, #tpu.memory_space<semaphore_mem>> -> memref<1x!tpu.dma_semaphore, #tpu.memory_space<semaphore_mem>>
    %23 = tpu.memref_squeeze %22 : memref<1x!tpu.dma_semaphore, #tpu.memory_space<semaphore_mem>> -> memref<!tpu.dma_semaphore, #tpu.memory_space<semaphore_mem>>
    tpu.enqueue_dma source(%19 : memref<128x256xbf16, #tpu.memory_space<any>>) target(%21 : memref<128x256xbf16, #tpu.memory_space<vmem>>) target_semaphore(%23 : memref<!tpu.dma_semaphore, #tpu.memory_space<semaphore_mem>>)
    %c4_i32 = arith.constant 4 : i32
    %24 = tpu.memref_slice %arg9[%c4_i32] : memref<5x!tpu.dma_semaphore, #tpu.memory_space<semaphore_mem>> -> memref<1x!tpu.dma_semaphore, #tpu.memory_space<semaphore_mem>>
    %25 = tpu.memref_squeeze %24 : memref<1x!tpu.dma_semaphore, #tpu.memory_space<semaphore_mem>> -> memref<!tpu.dma_semaphore, #tpu.memory_space<semaphore_mem>>
    tpu.enqueue_dma source(%arg5 : memref<128x128xbf16, #tpu.memory_space<any>>) target(%arg8 : memref<128x128xbf16, #tpu.memory_space<vmem>>) target_semaphore(%25 : memref<!tpu.dma_semaphore, #tpu.memory_space<semaphore_mem>>)
    %c0 = arith.constant 0 : index
    %c0_24 = arith.constant 0 : index
    %26 = vector.load %arg0[%c0, %c0_24] : memref<8x128xf32, #tpu.memory_space<vmem>>, vector<8x128xf32>
    %cst = arith.constant 0.999949991 : f32
    %27 = vector.broadcast %cst : f32 to vector<8x128xf32>
    %28 = arith.mulf %26, %27 : vector<8x128xf32>
    %c0_25 = arith.constant 0 : index
    %c0_26 = arith.constant 0 : index
    %c0_27 = arith.constant 0 : index
    %29 = vector.load %arg1[%c0_25, %c0_26, %c0_27] : memref<5x8x128xf32, #tpu.memory_space<vmem>>, vector<1x8x128xf32>
    %30 = vector.shape_cast %29 : vector<1x8x128xf32> to vector<8x128xf32>
    %cst_28 = arith.constant 0.00999999977 : f32
    %31 = vector.broadcast %cst_28 : f32 to vector<8x128xf32>
    %32 = arith.mulf %31, %30 : vector<8x128xf32>
    %33 = arith.addf %28, %32 : vector<8x128xf32>
    %cst_29 = arith.constant 0.997459292 : f32
    %34 = vector.broadcast %cst_29 : f32 to vector<8x128xf32>
    %35 = arith.mulf %33, %34 : vector<8x128xf32>
    %c1 = arith.constant 1 : index
    %c0_30 = arith.constant 0 : index
    %c0_31 = arith.constant 0 : index
    %36 = vector.load %arg1[%c1, %c0_30, %c0_31] : memref<5x8x128xf32, #tpu.memory_space<vmem>>, vector<1x8x128xf32>
    %37 = vector.shape_cast %36 : vector<1x8x128xf32> to vector<8x128xf32>
    %cst_32 = arith.constant 0.0712390319 : f32
    %38 = vector.broadcast %cst_32 : f32 to vector<8x128xf32>
    %39 = arith.mulf %38, %37 : vector<8x128xf32>
    %40 = arith.addf %35, %39 : vector<8x128xf32>
    %cst_33 = arith.constant 0.994962334 : f32
    %41 = vector.broadcast %cst_33 : f32 to vector<8x128xf32>
    %42 = arith.mulf %40, %41 : vector<8x128xf32>
    %c2 = arith.constant 2 : index
    %c0_34 = arith.constant 0 : index
    %c0_35 = arith.constant 0 : index
    %43 = vector.load %arg1[%c2, %c0_34, %c0_35] : memref<5x8x128xf32, #tpu.memory_space<vmem>>, vector<1x8x128xf32>
    %44 = vector.shape_cast %43 : vector<1x8x128xf32> to vector<8x128xf32>
    %cst_36 = arith.constant 0.100249685 : f32
    %45 = vector.broadcast %cst_36 : f32 to vector<8x128xf32>
    %46 = arith.mulf %45, %44 : vector<8x128xf32>
    %47 = arith.addf %42, %46 : vector<8x128xf32>
    %cst_37 = arith.constant 0.992459058 : f32
    %48 = vector.broadcast %cst_37 : f32 to vector<8x128xf32>
    %49 = arith.mulf %47, %48 : vector<8x128xf32>
    %c3 = arith.constant 3 : index
    %c0_38 = arith.constant 0 : index
    %c0_39 = arith.constant 0 : index
    %50 = vector.load %arg1[%c3, %c0_38, %c0_39] : memref<5x8x128xf32, #tpu.memory_space<vmem>>, vector<1x8x128xf32>
    %51 = vector.shape_cast %50 : vector<1x8x128xf32> to vector<8x128xf32>
    %cst_40 = arith.constant 0.122576505 : f32
    %52 = vector.broadcast %cst_40 : f32 to vector<8x128xf32>
    %53 = arith.mulf %52, %51 : vector<8x128xf32>
    %54 = arith.addf %49, %53 : vector<8x128xf32>
    %cst_41 = arith.constant 0.989949464 : f32
    %55 = vector.broadcast %cst_41 : f32 to vector<8x128xf32>
    %56 = arith.mulf %54, %55 : vector<8x128xf32>
    %c4 = arith.constant 4 : index
    %c0_42 = arith.constant 0 : index
    %c0_43 = arith.constant 0 : index
    %57 = vector.load %arg1[%c4, %c0_42, %c0_43] : memref<5x8x128xf32, #tpu.memory_space<vmem>>, vector<1x8x128xf32>
    %58 = vector.shape_cast %57 : vector<1x8x128xf32> to vector<8x128xf32>
    %cst_44 = arith.constant 0.141421363 : f32
    %59 = vector.broadcast %cst_44 : f32 to vector<8x128xf32>
    %60 = arith.mulf %59, %58 : vector<8x128xf32>
    %61 = arith.addf %56, %60 : vector<8x128xf32>
    %cst_45 = arith.constant 0.49747467 : f32
    %62 = vector.broadcast %cst_45 : f32 to vector<8x128xf32>
    %63 = arith.mulf %62, %61 : vector<8x128xf32>
    %64 = arith.mulf %63, %61 : vector<8x128xf32>
    %c3_i32_46 = arith.constant 3 : i32
    %c3_i32_47 = arith.constant 3 : i32
    %c3_i32_48 = arith.constant 3 : i32
    %c0_i32_49 = arith.constant 0 : i32
    %c0_i32_50 = arith.constant 0 : i32
    %65 = tpu.memref_slice %arg4[%c3_i32_46, %c0_i32_49, %c0_i32_50] : memref<4x128x256xbf16, #tpu.memory_space<any>> -> memref<1x128x256xbf16, #tpu.memory_space<any>>
    %66 = tpu.memref_squeeze %65 : memref<1x128x256xbf16, #tpu.memory_space<any>> -> memref<128x256xbf16, #tpu.memory_space<any>>
    %c0_i32_51 = arith.constant 0 : i32
    %c0_i32_52 = arith.constant 0 : i32
    %67 = tpu.memref_slice %arg7[%c3_i32_47, %c0_i32_51, %c0_i32_52] : memref<4x128x256xbf16, #tpu.memory_space<vmem>> -> memref<1x128x256xbf16, #tpu.memory_space<vmem>>
    %68 = tpu.memref_squeeze %67 : memref<1x128x256xbf16, #tpu.memory_space<vmem>> -> memref<128x256xbf16, #tpu.memory_space<vmem>>
    %69 = tpu.memref_slice %arg9[%c3_i32_48] : memref<5x!tpu.dma_semaphore, #tpu.memory_space<semaphore_mem>> -> memref<1x!tpu.dma_semaphore, #tpu.memory_space<semaphore_mem>>
    %70 = tpu.memref_squeeze %69 : memref<1x!tpu.dma_semaphore, #tpu.memory_space<semaphore_mem>> -> memref<!tpu.dma_semaphore, #tpu.memory_space<semaphore_mem>>
    tpu.wait_dma2 semaphore(%70 : memref<!tpu.dma_semaphore, #tpu.memory_space<semaphore_mem>>) src(%66 : memref<128x256xbf16, #tpu.memory_space<any>>) dst(%68 : memref<128x256xbf16, #tpu.memory_space<vmem>>)
    %c3_53 = arith.constant 3 : index
    %c0_54 = arith.constant 0 : index
    %c0_55 = arith.constant 0 : index
    %71 = vector.load %arg7[%c3_53, %c0_54, %c0_55] : memref<4x128x256xbf16, #tpu.memory_space<vmem>>, vector<1x128x256xbf16>
    %72 = vector.shape_cast %71 : vector<1x128x256xbf16> to vector<128x256xbf16>
    %73 = arith.extf %72 : vector<128x256xbf16> to vector<128x256xf32>
    %c3_56 = arith.constant 3 : index
    %c0_57 = arith.constant 0 : index
    %74 = vector.load %arg2[%c3_56, %c0_57] : memref<4x256xf32, #tpu.memory_space<vmem>>, vector<1x256xf32>
    %cst_58 = arith.constant dense<0.000000e+00> : vector<8x256xf32>
    %75 = tpu.matmul %40, %73, %cst_58 {dimension_numbers = #tpu.dot_dimension_numbers<[1], [0], [0], [1], [0, 0, 1, 1], [], []>} : vector<8x128xf32>, vector<128x256xf32>, vector<8x256xf32> -> vector<8x256xf32>
    %76 = vector.broadcast %74 : vector<1x256xf32> to vector<8x256xf32>
    %77 = arith.addf %75, %76 : vector<8x256xf32>
    %78 = vector.extract_strided_slice %77 {offsets = [0, 0], sizes = [8, 128], strides = [1, 1]} : vector<8x256xf32> to vector<8x128xf32>
    %79 = vector.extract_strided_slice %77 {offsets = [0, 128], sizes = [8, 128], strides = [1, 1]} : vector<8x256xf32> to vector<8x128xf32>
    %80 = arith.subf %33, %78 : vector<8x128xf32>
    %cst_59 = arith.constant 5.000000e-01 : f32
    %81 = vector.broadcast %cst_59 : f32 to vector<8x128xf32>
    %82 = arith.mulf %81, %80 : vector<8x128xf32>
    %83 = arith.mulf %82, %80 : vector<8x128xf32>
    %cst_60 = arith.constant 0.000000e+00 : f32
    %84 = vector.broadcast %cst_60 : f32 to vector<8x128xf32>
    %85 = arith.subf %84, %79 : vector<8x128xf32>
    %86 = math.exp %85 : vector<8x128xf32>
    %87 = arith.mulf %83, %86 : vector<8x128xf32>
    %88 = arith.addf %64, %87 : vector<8x128xf32>
    %cst_61 = arith.constant 5.000000e-01 : f32
    %89 = vector.broadcast %cst_61 : f32 to vector<8x128xf32>
    %90 = arith.mulf %89, %79 : vector<8x128xf32>
    %91 = arith.addf %88, %90 : vector<8x128xf32>
    %92 = arith.mulf %33, %33 : vector<8x128xf32>
    %cst_62 = arith.constant 1.25006254E-5 : f32
    %93 = vector.broadcast %cst_62 : f32 to vector<8x128xf32>
    %94 = arith.mulf %93, %92 : vector<8x128xf32>
    %95 = arith.subf %91, %94 : vector<8x128xf32>
    %c2_i32_63 = arith.constant 2 : i32
    %c2_i32_64 = arith.constant 2 : i32
    %c2_i32_65 = arith.constant 2 : i32
    %c0_i32_66 = arith.constant 0 : i32
    %c0_i32_67 = arith.constant 0 : i32
    %96 = tpu.memref_slice %arg4[%c2_i32_63, %c0_i32_66, %c0_i32_67] : memref<4x128x256xbf16, #tpu.memory_space<any>> -> memref<1x128x256xbf16, #tpu.memory_space<any>>
    %97 = tpu.memref_squeeze %96 : memref<1x128x256xbf16, #tpu.memory_space<any>> -> memref<128x256xbf16, #tpu.memory_space<any>>
    %c0_i32_68 = arith.constant 0 : i32
    %c0_i32_69 = arith.constant 0 : i32
    %98 = tpu.memref_slice %arg7[%c2_i32_64, %c0_i32_68, %c0_i32_69] : memref<4x128x256xbf16, #tpu.memory_space<vmem>> -> memref<1x128x256xbf16, #tpu.memory_space<vmem>>
    %99 = tpu.memref_squeeze %98 : memref<1x128x256xbf16, #tpu.memory_space<vmem>> -> memref<128x256xbf16, #tpu.memory_space<vmem>>
    %100 = tpu.memref_slice %arg9[%c2_i32_65] : memref<5x!tpu.dma_semaphore, #tpu.memory_space<semaphore_mem>> -> memref<1x!tpu.dma_semaphore, #tpu.memory_space<semaphore_mem>>
    %101 = tpu.memref_squeeze %100 : memref<1x!tpu.dma_semaphore, #tpu.memory_space<semaphore_mem>> -> memref<!tpu.dma_semaphore, #tpu.memory_space<semaphore_mem>>
    tpu.wait_dma2 semaphore(%101 : memref<!tpu.dma_semaphore, #tpu.memory_space<semaphore_mem>>) src(%97 : memref<128x256xbf16, #tpu.memory_space<any>>) dst(%99 : memref<128x256xbf16, #tpu.memory_space<vmem>>)
    %c2_70 = arith.constant 2 : index
    %c0_71 = arith.constant 0 : index
    %c0_72 = arith.constant 0 : index
    %102 = vector.load %arg7[%c2_70, %c0_71, %c0_72] : memref<4x128x256xbf16, #tpu.memory_space<vmem>>, vector<1x128x256xbf16>
    %103 = vector.shape_cast %102 : vector<1x128x256xbf16> to vector<128x256xbf16>
    %104 = arith.extf %103 : vector<128x256xbf16> to vector<128x256xf32>
    %c2_73 = arith.constant 2 : index
    %c0_74 = arith.constant 0 : index
    %105 = vector.load %arg2[%c2_73, %c0_74] : memref<4x256xf32, #tpu.memory_space<vmem>>, vector<1x256xf32>
    %cst_75 = arith.constant dense<0.000000e+00> : vector<8x256xf32>
    %106 = tpu.matmul %47, %104, %cst_75 {dimension_numbers = #tpu.dot_dimension_numbers<[1], [0], [0], [1], [0, 0, 1, 1], [], []>} : vector<8x128xf32>, vector<128x256xf32>, vector<8x256xf32> -> vector<8x256xf32>
    %107 = vector.broadcast %105 : vector<1x256xf32> to vector<8x256xf32>
    %108 = arith.addf %106, %107 : vector<8x256xf32>
    %109 = vector.extract_strided_slice %108 {offsets = [0, 0], sizes = [8, 128], strides = [1, 1]} : vector<8x256xf32> to vector<8x128xf32>
    %110 = vector.extract_strided_slice %108 {offsets = [0, 128], sizes = [8, 128], strides = [1, 1]} : vector<8x256xf32> to vector<8x128xf32>
    %111 = arith.subf %40, %109 : vector<8x128xf32>
    %cst_76 = arith.constant 5.000000e-01 : f32
    %112 = vector.broadcast %cst_76 : f32 to vector<8x128xf32>
    %113 = arith.mulf %112, %111 : vector<8x128xf32>
    %114 = arith.mulf %113, %111 : vector<8x128xf32>
    %cst_77 = arith.constant 0.000000e+00 : f32
    %115 = vector.broadcast %cst_77 : f32 to vector<8x128xf32>
    %116 = arith.subf %115, %110 : vector<8x128xf32>
    %117 = math.exp %116 : vector<8x128xf32>
    %118 = arith.mulf %114, %117 : vector<8x128xf32>
    %119 = arith.addf %95, %118 : vector<8x128xf32>
    %cst_78 = arith.constant 5.000000e-01 : f32
    %120 = vector.broadcast %cst_78 : f32 to vector<8x128xf32>
    %121 = arith.mulf %120, %110 : vector<8x128xf32>
    %122 = arith.addf %119, %121 : vector<8x128xf32>
    %123 = arith.mulf %40, %40 : vector<8x128xf32>
    %cst_79 = arith.constant 6.35989825E-4 : f32
    %124 = vector.broadcast %cst_79 : f32 to vector<8x128xf32>
    %125 = arith.mulf %124, %123 : vector<8x128xf32>
    %126 = arith.subf %122, %125 : vector<8x128xf32>
    %c1_i32_80 = arith.constant 1 : i32
    %c1_i32_81 = arith.constant 1 : i32
    %c1_i32_82 = arith.constant 1 : i32
    %c0_i32_83 = arith.constant 0 : i32
    %c0_i32_84 = arith.constant 0 : i32
    %127 = tpu.memref_slice %arg4[%c1_i32_80, %c0_i32_83, %c0_i32_84] : memref<4x128x256xbf16, #tpu.memory_space<any>> -> memref<1x128x256xbf16, #tpu.memory_space<any>>
    %128 = tpu.memref_squeeze %127 : memref<1x128x256xbf16, #tpu.memory_space<any>> -> memref<128x256xbf16, #tpu.memory_space<any>>
    %c0_i32_85 = arith.constant 0 : i32
    %c0_i32_86 = arith.constant 0 : i32
    %129 = tpu.memref_slice %arg7[%c1_i32_81, %c0_i32_85, %c0_i32_86] : memref<4x128x256xbf16, #tpu.memory_space<vmem>> -> memref<1x128x256xbf16, #tpu.memory_space<vmem>>
    %130 = tpu.memref_squeeze %129 : memref<1x128x256xbf16, #tpu.memory_space<vmem>> -> memref<128x256xbf16, #tpu.memory_space<vmem>>
    %131 = tpu.memref_slice %arg9[%c1_i32_82] : memref<5x!tpu.dma_semaphore, #tpu.memory_space<semaphore_mem>> -> memref<1x!tpu.dma_semaphore, #tpu.memory_space<semaphore_mem>>
    %132 = tpu.memref_squeeze %131 : memref<1x!tpu.dma_semaphore, #tpu.memory_space<semaphore_mem>> -> memref<!tpu.dma_semaphore, #tpu.memory_space<semaphore_mem>>
    tpu.wait_dma2 semaphore(%132 : memref<!tpu.dma_semaphore, #tpu.memory_space<semaphore_mem>>) src(%128 : memref<128x256xbf16, #tpu.memory_space<any>>) dst(%130 : memref<128x256xbf16, #tpu.memory_space<vmem>>)
    %c1_87 = arith.constant 1 : index
    %c0_88 = arith.constant 0 : index
    %c0_89 = arith.constant 0 : index
    %133 = vector.load %arg7[%c1_87, %c0_88, %c0_89] : memref<4x128x256xbf16, #tpu.memory_space<vmem>>, vector<1x128x256xbf16>
    %134 = vector.shape_cast %133 : vector<1x128x256xbf16> to vector<128x256xbf16>
    %135 = arith.extf %134 : vector<128x256xbf16> to vector<128x256xf32>
    %c1_90 = arith.constant 1 : index
    %c0_91 = arith.constant 0 : index
    %136 = vector.load %arg2[%c1_90, %c0_91] : memref<4x256xf32, #tpu.memory_space<vmem>>, vector<1x256xf32>
    %cst_92 = arith.constant dense<0.000000e+00> : vector<8x256xf32>
    %137 = tpu.matmul %54, %135, %cst_92 {dimension_numbers = #tpu.dot_dimension_numbers<[1], [0], [0], [1], [0, 0, 1, 1], [], []>} : vector<8x128xf32>, vector<128x256xf32>, vector<8x256xf32> -> vector<8x256xf32>
    %138 = vector.broadcast %136 : vector<1x256xf32> to vector<8x256xf32>
    %139 = arith.addf %137, %138 : vector<8x256xf32>
    %140 = vector.extract_strided_slice %139 {offsets = [0, 0], sizes = [8, 128], strides = [1, 1]} : vector<8x256xf32> to vector<8x128xf32>
    %141 = vector.extract_strided_slice %139 {offsets = [0, 128], sizes = [8, 128], strides = [1, 1]} : vector<8x256xf32> to vector<8x128xf32>
    %142 = arith.subf %47, %140 : vector<8x128xf32>
    %cst_93 = arith.constant 5.000000e-01 : f32
    %143 = vector.broadcast %cst_93 : f32 to vector<8x128xf32>
    %144 = arith.mulf %143, %142 : vector<8x128xf32>
    %145 = arith.mulf %144, %142 : vector<8x128xf32>
    %cst_94 = arith.constant 0.000000e+00 : f32
    %146 = vector.broadcast %cst_94 : f32 to vector<8x128xf32>
    %147 = arith.subf %146, %141 : vector<8x128xf32>
    %148 = math.exp %147 : vector<8x128xf32>
    %149 = arith.mulf %145, %148 : vector<8x128xf32>
    %150 = arith.addf %126, %149 : vector<8x128xf32>
    %cst_95 = arith.constant 5.000000e-01 : f32
    %151 = vector.broadcast %cst_95 : f32 to vector<8x128xf32>
    %152 = arith.mulf %151, %141 : vector<8x128xf32>
    %153 = arith.addf %150, %152 : vector<8x128xf32>
    %154 = arith.mulf %47, %47 : vector<8x128xf32>
    %cst_96 = arith.constant 0.00126260263 : f32
    %155 = vector.broadcast %cst_96 : f32 to vector<8x128xf32>
    %156 = arith.mulf %155, %154 : vector<8x128xf32>
    %157 = arith.subf %153, %156 : vector<8x128xf32>
    %c0_i32_97 = arith.constant 0 : i32
    %c0_i32_98 = arith.constant 0 : i32
    %c0_i32_99 = arith.constant 0 : i32
    %c0_i32_100 = arith.constant 0 : i32
    %c0_i32_101 = arith.constant 0 : i32
    %158 = tpu.memref_slice %arg4[%c0_i32_97, %c0_i32_100, %c0_i32_101] : memref<4x128x256xbf16, #tpu.memory_space<any>> -> memref<1x128x256xbf16, #tpu.memory_space<any>>
    %159 = tpu.memref_squeeze %158 : memref<1x128x256xbf16, #tpu.memory_space<any>> -> memref<128x256xbf16, #tpu.memory_space<any>>
    %c0_i32_102 = arith.constant 0 : i32
    %c0_i32_103 = arith.constant 0 : i32
    %160 = tpu.memref_slice %arg7[%c0_i32_98, %c0_i32_102, %c0_i32_103] : memref<4x128x256xbf16, #tpu.memory_space<vmem>> -> memref<1x128x256xbf16, #tpu.memory_space<vmem>>
    %161 = tpu.memref_squeeze %160 : memref<1x128x256xbf16, #tpu.memory_space<vmem>> -> memref<128x256xbf16, #tpu.memory_space<vmem>>
    %162 = tpu.memref_slice %arg9[%c0_i32_99] : memref<5x!tpu.dma_semaphore, #tpu.memory_space<semaphore_mem>> -> memref<1x!tpu.dma_semaphore, #tpu.memory_space<semaphore_mem>>
    %163 = tpu.memref_squeeze %162 : memref<1x!tpu.dma_semaphore, #tpu.memory_space<semaphore_mem>> -> memref<!tpu.dma_semaphore, #tpu.memory_space<semaphore_mem>>
    tpu.wait_dma2 semaphore(%163 : memref<!tpu.dma_semaphore, #tpu.memory_space<semaphore_mem>>) src(%159 : memref<128x256xbf16, #tpu.memory_space<any>>) dst(%161 : memref<128x256xbf16, #tpu.memory_space<vmem>>)
    %c0_104 = arith.constant 0 : index
    %c0_105 = arith.constant 0 : index
    %c0_106 = arith.constant 0 : index
    %164 = vector.load %arg7[%c0_104, %c0_105, %c0_106] : memref<4x128x256xbf16, #tpu.memory_space<vmem>>, vector<1x128x256xbf16>
    %165 = vector.shape_cast %164 : vector<1x128x256xbf16> to vector<128x256xbf16>
    %166 = arith.extf %165 : vector<128x256xbf16> to vector<128x256xf32>
    %c0_107 = arith.constant 0 : index
    %c0_108 = arith.constant 0 : index
    %167 = vector.load %arg2[%c0_107, %c0_108] : memref<4x256xf32, #tpu.memory_space<vmem>>, vector<1x256xf32>
    %cst_109 = arith.constant dense<0.000000e+00> : vector<8x256xf32>
    %168 = tpu.matmul %61, %166, %cst_109 {dimension_numbers = #tpu.dot_dimension_numbers<[1], [0], [0], [1], [0, 0, 1, 1], [], []>} : vector<8x128xf32>, vector<128x256xf32>, vector<8x256xf32> -> vector<8x256xf32>
    %169 = vector.broadcast %167 : vector<1x256xf32> to vector<8x256xf32>
    %170 = arith.addf %168, %169 : vector<8x256xf32>
    %171 = vector.extract_strided_slice %170 {offsets = [0, 0], sizes = [8, 128], strides = [1, 1]} : vector<8x256xf32> to vector<8x128xf32>
    %172 = vector.extract_strided_slice %170 {offsets = [0, 128], sizes = [8, 128], strides = [1, 1]} : vector<8x256xf32> to vector<8x128xf32>
    %173 = arith.subf %54, %171 : vector<8x128xf32>
    %cst_110 = arith.constant 5.000000e-01 : f32
    %174 = vector.broadcast %cst_110 : f32 to vector<8x128xf32>
    %175 = arith.mulf %174, %173 : vector<8x128xf32>
    %176 = arith.mulf %175, %173 : vector<8x128xf32>
    %cst_111 = arith.constant 0.000000e+00 : f32
    %177 = vector.broadcast %cst_111 : f32 to vector<8x128xf32>
    %178 = arith.subf %177, %172 : vector<8x128xf32>
    %179 = math.exp %178 : vector<8x128xf32>
    %180 = arith.mulf %176, %179 : vector<8x128xf32>
    %181 = arith.addf %157, %180 : vector<8x128xf32>
    %cst_112 = arith.constant 5.000000e-01 : f32
    %182 = vector.broadcast %cst_112 : f32 to vector<8x128xf32>
    %183 = arith.mulf %182, %172 : vector<8x128xf32>
    %184 = arith.addf %181, %183 : vector<8x128xf32>
    %185 = arith.mulf %54, %54 : vector<8x128xf32>
    %cst_113 = arith.constant 0.00189236831 : f32
    %186 = vector.broadcast %cst_113 : f32 to vector<8x128xf32>
    %187 = arith.mulf %186, %185 : vector<8x128xf32>
    %188 = arith.subf %184, %187 : vector<8x128xf32>
    %c4_i32_114 = arith.constant 4 : i32
    %189 = tpu.memref_slice %arg9[%c4_i32_114] : memref<5x!tpu.dma_semaphore, #tpu.memory_space<semaphore_mem>> -> memref<1x!tpu.dma_semaphore, #tpu.memory_space<semaphore_mem>>
    %190 = tpu.memref_squeeze %189 : memref<1x!tpu.dma_semaphore, #tpu.memory_space<semaphore_mem>> -> memref<!tpu.dma_semaphore, #tpu.memory_space<semaphore_mem>>
    tpu.wait_dma2 semaphore(%190 : memref<!tpu.dma_semaphore, #tpu.memory_space<semaphore_mem>>) src(%arg5 : memref<128x128xbf16, #tpu.memory_space<any>>) dst(%arg8 : memref<128x128xbf16, #tpu.memory_space<vmem>>)
    %c0_115 = arith.constant 0 : index
    %c0_116 = arith.constant 0 : index
    %191 = vector.load %arg8[%c0_115, %c0_116] : memref<128x128xbf16, #tpu.memory_space<vmem>>, vector<128x128xbf16>
    %192 = arith.extf %191 : vector<128x128xbf16> to vector<128x128xf32>
    %cst_117 = arith.constant dense<0.000000e+00> : vector<8x128xf32>
    %193 = tpu.matmul %33, %192, %cst_117 {dimension_numbers = #tpu.dot_dimension_numbers<[1], [0], [0], [1], [0, 0, 1, 1], [], []>} : vector<8x128xf32>, vector<128x128xf32>, vector<8x128xf32> -> vector<8x128xf32>
    %c0_118 = arith.constant 0 : index
    %c0_119 = arith.constant 0 : index
    %194 = vector.load %arg3[%c0_118, %c0_119] : memref<1x128xf32, #tpu.memory_space<vmem>>, vector<1x128xf32>
    %195 = vector.broadcast %194 : vector<1x128xf32> to vector<8x128xf32>
    %196 = arith.addf %193, %195 : vector<8x128xf32>
    %197 = arith.subf %26, %196 : vector<8x128xf32>
    %198 = arith.mulf %197, %197 : vector<8x128xf32>
    %cst_120 = arith.constant 6.250000e-02 : f32
    %199 = vector.broadcast %cst_120 : f32 to vector<8x128xf32>
    %200 = arith.mulf %198, %199 : vector<8x128xf32>
    %201 = arith.addf %188, %200 : vector<8x128xf32>
    %202 = vector.shape_cast %201 : vector<8x128xf32> to vector<1x8x128xf32>
    %cst_121 = arith.constant dense<0.000000e+00> : vector<1xf32>
    %203 = vector.multi_reduction <add>, %202, %cst_121 [1, 2] : vector<1x8x128xf32> to vector<1xf32>
    %204 = vector.shape_cast %203 : vector<1xf32> to vector<1x1x1xf32>
    %205 = vector.extract %204[0, 0, 0] : f32 from vector<1x1x1xf32>
    %cst_122 = arith.constant 14046.0801 : f32
    %206 = arith.addf %205, %cst_122 : f32
    %c0_123 = arith.constant 0 : index
    %c0_124 = arith.constant 0 : index
    %207 = memref.load %arg6[%c0_123, %c0_124] : memref<1x1xf32, #tpu.memory_space<smem>>
    memref.store %206, %arg6[%c0_123, %c0_124] : memref<1x1xf32, #tpu.memory_space<smem>>
    return
  }
}

</mosaic_0001>

<bundles_post_ra>
// kernel: diffusion_loss.1
= control target key start
LH: loop header
LB: loop body
LE: loop exit
PB: predicated region body
PF: predicated region fallthrough
CT: control target
= control target key end

     0   :  { %11 = vsyncpa [#allocation6], 0  ;;  %s1432_s0 = inlined_call_operand.hbm [shape: f32[8,128], index: 0, kind: input, shape index: {}]   ;;  %s1433_s1 = inlined_call_operand.hbm [shape: f32[5,8,128], index: 1, kind: input, shape index: {}]   ;;  %s1434_s2 = inlined_call_operand.hbm [shape: f32[4,256], index: 2, kind: input, shape index: {}]   ;;  %s1435_s3 = inlined_call_operand.vmem [shape: f32[1,128], index: 3, kind: input, shape index: {}]   ;;  %s1436_s4 = inlined_call_operand.hbm [shape: bf16[4,128,256], index: 4, kind: input, shape index: {}]   ;;  %s1437_s5 = inlined_call_operand.hbm [shape: bf16[128,128], index: 5, kind: input, shape index: {}]   ;;  %s1438_s6 = inlined_call_operand.hbm [shape: f32[1,1], index: 6, kind: output, shape index: {}]  }
   0x1   :  { %12 = vsyncpa [#allocation9], 0 }
   0x2   :  { %13 = vsyncpa [#allocation7], 0  ;;  %s1228_s21 = smov [#allocation8]  }
   0x3   :  { %s29_s22 = sshll.u32 %s1228_s21, 4  ;;  %s30_s22 = int_to_ptr.vmem [resolvable:$true] %s29_s22 }
   0x4   :  { %s1043_s23 = scalar_lea.vmem %s30_s22, 640  ;;  %p1048_p1 = scmp.lt.s32.totalorder %s30_s22, %s30_s22 }
   0x5   :  { %p1044_p0 = scmp.ne.s32.totalorder %s30_s22, %s1043_s23  ;;  %p1049_p2 = scmp.lt.s32.totalorder %s1043_s23, %s1043_s23 }
   0x7   :  { %p1050_p3 = por %p1049_p2, %p1048_p1 }
   0x9   :  { %p1051_p4 = pnand %p1050_p3, %p1044_p0 }
   0xb   :  { %1054 = shalt.err (!%p1051_p4)
}
   0xc   :  { %s1229_s24 = smov 128   ;;  %s1230_s25 = smov 8  }
   0xd   :  { %35 = dma.hbm_to_vmem [thread:$0]  %s1433_s1, 640, %s30_s22, [#allocation9], %s1229_s24, %s1229_s24, %s1230_s25  }
   0xe   :  { %s1231_s28 = smov [#allocation5]   ;;  %s1232_s30 = smov [#allocation10]  }
   0xf   :  { %s20_s29 = sshll.u32 %s1231_s28, 4  ;;  %s42_s7 = sshll.u32 %s1232_s30, 4  ;;  %s21_s29 = int_to_ptr.vmem [resolvable:$true] %s20_s29  ;;  %s43_s7 = int_to_ptr.vmem [resolvable:$true] %s42_s7 }
  0x10   :  { %s1063_s8 = scalar_lea.vmem %s21_s29, 128  ;;  %p1068_p6 = scmp.lt.s32.totalorder %s21_s29, %s21_s29 }
  0x11   :  { %p1064_p5 = scmp.ne.s32.totalorder %s21_s29, %s1063_s8  ;;  %p1069_p7 = scmp.lt.s32.totalorder %s1063_s8, %s1063_s8 }
  0x13   :  { %p1070_p8 = por %p1069_p7, %p1068_p6 }
  0x15   :  { %p1071_p9 = pnand %p1070_p8, %p1064_p5 }
  0x17   :  { %1074 = shalt.err (!%p1071_p9)
}
  0x18   :  { %23 = dma.hbm_to_vmem [thread:$0]  %s1432_s0, 128, %s21_s29, [#allocation6]  }
  0x19   :  { %s1083_s11 = scalar_lea.vmem %s43_s7, 128  ;;  %p1088_p11 = scmp.lt.s32.totalorder %s43_s7, %s43_s7 }
  0x1a   :  { %p1084_p10 = scmp.ne.s32.totalorder %s43_s7, %s1083_s11  ;;  %p1089_p12 = scmp.lt.s32.totalorder %s1083_s11, %s1083_s11 }
  0x1c   :  { %p1090_p13 = por %p1089_p12, %p1088_p11 }
  0x1e   :  { %p1091_p0 = pnand %p1090_p13, %p1084_p10 }
  0x20   :  { %1094 = shalt.err (!%p1091_p0)
}
  0x21   :  { %45 = dma.hbm_to_vmem [thread:$0]  %s1434_s2, 128, %s43_s7, [#allocation9]  }
  0x22   :  { %1212 = dma.done.wait [#allocation6], 128  }
  0x23   :  { %1213 = vsyncadd [#allocation6], 4294967168 }
  0x24   :  { %1214 = dma.done.wait [#allocation9], 768  }
  0x25   :  { %1215 = vsyncadd [#allocation9], 4294966528  ;;  %s57_s0 = scalar_lea.hbm %s1436_s4, 6144  ;;  %s1233_s15 = smov [#allocation2 + $0x180]  }
  0x26   :  { %s67_s16 = sshll.u32 %s1233_s15, 4  ;;  %s71_s19 = scalar_lea.hbm %s1436_s4, 4096  ;;  %s68_s16 = int_to_ptr.vmem [resolvable:$true] %s67_s16 }
  0x27   :  { %s1105_s20 = scalar_lea.vmem %s68_s16, 2048  ;;  %s1234_s21 = smov [#allocation2]  }
  0x28   :  { %p1106_p1 = scmp.ne.s32.totalorder %s68_s16, %s1105_s20  ;;  %s1107_s22 = sshll.u32 %s1234_s21, 4  ;;  %s1291_s22 = int_to_ptr.vmem [resolvable:$false] %s1107_s22 }
  0x29   :  { %s1294_s2 = scalar_lea.vmem %s1291_s22, 8192  ;;  %p1110_p2 = scmp.lt.s32.totalorder %s68_s16, %s1291_s22 }
  0x2a   :  { %p1111_p3 = scmp.lt.s32.totalorder %s1294_s2, %s1105_s20 }
  0x2c   :  { %p1112_p4 = por %p1111_p3, %p1110_p2 }
  0x2e   :  { %p1113_p5 = pnand %p1112_p4, %p1106_p1 }
  0x30   :  { %1116 = shalt.err (!%p1113_p5)  }
  0x31   :  { %70 = dma.hbm_to_vmem [thread:$0]  %s57_s0, 2048, %s68_s16, [#allocation4 + $0x3] }
  0x32   :  { %s1235_s23 = smov [#allocation2 + $0x100]   ;;  %s85_s27 = scalar_lea.hbm %s1436_s4, 2048 }
  0x33   :  { %s81_s24 = sshll.u32 %s1235_s23, 4  ;;  %s82_s24 = int_to_ptr.vmem [resolvable:$true] %s81_s24 }
  0x34   :  { %s1128_s28 = scalar_lea.vmem %s82_s24, 2048  ;;  %p1133_p7 = scmp.lt.s32.totalorder %s82_s24, %s1291_s22 }
  0x35   :  { %p1129_p6 = scmp.ne.s32.totalorder %s82_s24, %s1128_s28  ;;  %p1134_p8 = scmp.lt.s32.totalorder %s1294_s2, %s1128_s28 }
  0x37   :  { %p1135_p9 = por %p1134_p8, %p1133_p7 }
  0x39   :  { %p1136_p10 = pnand %p1135_p9, %p1129_p6 }
  0x3b   :  { %1139 = shalt.err (!%p1136_p10)  }
  0x3c   :  { %84 = dma.hbm_to_vmem [thread:$0]  %s71_s19, 2048, %s82_s24, [#allocation4 + $0x2]  ;;  %v1303_v0 = vld [vmem:[#allocation5] sm:$0xff]  ;;  %v124_v1 = vld [vmem:[#allocation8] sm:$0xff]  ;;  %v129_v2 = vld [vmem:[#allocation8 + $0x8] sm:$0xff] }
  0x3d   :  { %s1236_s29 = smov [#allocation2 + $0x80]   ;;  %v123_v3 = vmul.f32 0.99995, %v1303_v0  ;;  %v125_v4 = vmul.f32 0.01, %v124_v1 }
  0x3e   :  { %s95_s30 = sshll.u32 %s1236_s29, 4  ;;  %s96_s30 = int_to_ptr.vmem [resolvable:$true] %s95_s30 }
  0x3f   :  { %s1151_s7 = scalar_lea.vmem %s96_s30, 2048  ;;  %p1156_p12 = scmp.lt.s32.totalorder %s96_s30, %s1291_s22 }
  0x40   :  { %p1152_p11 = scmp.ne.s32.totalorder %s96_s30, %s1151_s7  ;;  %p1157_p13 = scmp.lt.s32.totalorder %s1294_s2, %s1151_s7 }
  0x42   :  { %p1158_p0 = por %p1157_p13, %p1156_p12 }
  0x44   :  { %p1159_p1 = pnand %p1158_p0, %p1152_p11 }
  0x46   :  { %1162 = shalt.err (!%p1159_p1)  }
  0x47   :  { %98 = dma.hbm_to_vmem [thread:$0]  %s85_s27, 2048, %s96_s30, [#allocation4 + $0x1]  ;;  %v1308_v5 = vadd.f32 %v125_v4, %v123_v3  ;;  %v130_v6 = vmul.f32 0.07123903, %v129_v2  ;;  %v134_v7 = vld [vmem:[#allocation8 + $0x10] sm:$0xff] }
  0x48   :  { %s1237_s8 = smov [#allocation3]   ;;  %s1172_s10 = scalar_lea.vmem %s1291_s22, 2048 }
  0x49   :  { %v127_v8 = vmul.f32 0.9974593, %v1308_v5  ;;  %s118_s9 = sshll.u32 %s1237_s8, 4  ;;  %p1173_p2 = scmp.ne.s32.totalorder %s1291_s22, %s1172_s10  ;;  %s119_s9 = int_to_ptr.vmem [resolvable:$true] %s118_s9 }
  0x4a   :  { %p1177_p3 = scmp.lt.s32.totalorder %s1291_s22, %s1291_s22  ;;  %p1178_p4 = scmp.lt.s32.totalorder %s1294_s2, %s1172_s10 }
  0x4c   :  { %p1179_p5 = por %p1178_p4, %p1177_p3 }
  0x4e   :  { %p1180_p6 = pnand %p1179_p5, %p1173_p2 }
  0x50   :  { %1183 = shalt.err (!%p1180_p6)  }
  0x51   :  { %109 = dma.hbm_to_vmem [thread:$0]  %s1436_s4, 2048, %s1291_s22, [#allocation4]  ;;  %v1320_v9 = vadd.f32 %v130_v6, %v127_v8  ;;  %v135_v10 = vmul.f32 0.100249685, %v134_v7 }
  0x52   :  { %v139_v11 = vld [vmem:[#allocation8 + $0x18] sm:$0xff]  ;;  %s1192_s12 = scalar_lea.vmem %s119_s9, 1024  ;;  %p1197_p8 = scmp.lt.s32.totalorder %s119_s9, %s119_s9 }
  0x53   :  { %p1193_p7 = scmp.ne.s32.totalorder %s119_s9, %s1192_s12  ;;  %p1198_p9 = scmp.lt.s32.totalorder %s1192_s12, %s1192_s12 }
  0x55   :  { %p1199_p10 = por %p1198_p9, %p1197_p8 }
  0x57   :  { %p1200_p11 = pnand %p1199_p10, %p1193_p7 }
  0x59   :  { %1203 = shalt.err (!%p1200_p11)  }
  0x5a   :  { %121 = dma.hbm_to_vmem [thread:$0]  %s1437_s5, 1024, %s119_s9, [#allocation4 + $0x4]  ;;  %v132_v12 = vmul.f32 0.99496233, %v1320_v9  ;;  %v140_v14 = vmul.f32 0.122576505, %v139_v11 }
  0x5b   :  { %v144_v15 = vld [vmem:[#allocation8 + $0x20] sm:$0xff] }
  0x5c   :  { %v1326_v13 = vadd.f32 %v135_v10, %v132_v12  ;;  %v145_v18 = vmul.f32 0.14142136, %v144_v15 }
  0x5e   :  { %v137_v16 = vmul.f32 0.99245906, %v1326_v13 }
  0x60   :  { %v1329_v17 = vadd.f32 %v140_v14, %v137_v16 }
  0x62   :  { %v142_v19 = vmul.f32 0.98994946, %v1329_v17 }
  0x64   :  { %v1332_v20 = vadd.f32 %v145_v18, %v142_v19 }
  0x66   :  { %v147_v21 = vmul.f32 0.49747467, %v1332_v20 }
  0x68   :  { %v1336_v22 = vmul.f32 %v147_v21, %v1332_v20 }
  0x69   :  { %1216 = dma.done.wait [#allocation4 + $0x3], 2048 }
  0x6a   :  { %1217 = vsyncadd [#allocation4 + $0x3], 4294965248  ;;  %v1238_v23 = vmov 0.0   ;;  %v168_v24 = vld [vmem:[#allocation2 + $0x1f8] sm:$0xff]  ;;  %v167_v25 = vld [vmem:[#allocation2 + $0x1f0] sm:$0xff]  ;;  %v204_v11 = vlaneseq }
  0x6b   :  { %278 = vmatprep.mubr.f32.mxu0 %v1238_v23  ;;  %v166_v26 = vld [vmem:[#allocation2 + $0x1e8] sm:$0xff]  ;;  %v200_v27 = vunpack.c.h.bf16 %v168_v24  ;;  %v199_v28 = vunpack.c.l.bf16 %v168_v24  ;;  %v198_v29 = vunpack.c.h.bf16 %v167_v25  ;;  %v197_v30 = vunpack.c.l.bf16 %v167_v25  ;;  %v165_v31 = vld [vmem:[#allocation2 + $0x1e0] sm:$0xff]  ;;  %v164_v34 = vld [vmem:[#allocation2 + $0x1d8] sm:$0xff] }
  0x6c   :  { %v196_v32 = vunpack.c.h.bf16 %v166_v26  ;;  %v195_v33 = vunpack.c.l.bf16 %v166_v26  ;;  %v194_v35 = vunpack.c.h.bf16 %v165_v31  ;;  %v193_v36 = vunpack.c.l.bf16 %v165_v31  ;;  %v163_v37 = vld [vmem:[#allocation2 + $0x1d0] sm:$0xff]  ;;  %v162_v40 = vld [vmem:[#allocation2 + $0x1c8] sm:$0xff]  ;;  %v161_v43 = vld [vmem:[#allocation2 + $0x1c0] sm:$0xff] }
  0x6d   :  { %214 = vmatprep.subr.mxu0 %v200_v27  ;;  %v192_v38 = vunpack.c.h.bf16 %v164_v34  ;;  %v191_v39 = vunpack.c.l.bf16 %v164_v34  ;;  %v190_v41 = vunpack.c.h.bf16 %v163_v37  ;;  %v189_v42 = vunpack.c.l.bf16 %v163_v37  ;;  %v160_v46 = vld [vmem:[#allocation2 + $0x1b8] sm:$0xff]  ;;  %v159_v49 = vld [vmem:[#allocation2 + $0x1b0] sm:$0xff]  ;;  %v158_v52 = vld [vmem:[#allocation2 + $0x1a8] sm:$0xff] }
  0x6e   :  { %215 = vmatpush1.msra.mxu0 %v199_v28  ;;  %v188_v44 = vunpack.c.h.bf16 %v162_v40  ;;  %v187_v45 = vunpack.c.l.bf16 %v162_v40  ;;  %v186_v47 = vunpack.c.h.bf16 %v161_v43  ;;  %v185_v48 = vunpack.c.l.bf16 %v161_v43  ;;  %v157_v55 = vld [vmem:[#allocation2 + $0x1a0] sm:$0xff]  ;;  %v156_v58 = vld [vmem:[#allocation2 + $0x198] sm:$0xff]  ;;  %v155_v61 = vld [vmem:[#allocation2 + $0x190] sm:$0xff] }
  0x6f   :  { %216 = vmatprep.subr.mxu0 %v198_v29  ;;  %v184_v50 = vunpack.c.h.bf16 %v160_v46  ;;  %v183_v51 = vunpack.c.l.bf16 %v160_v46  ;;  %v182_v53 = vunpack.c.h.bf16 %v159_v49  ;;  %v181_v54 = vunpack.c.l.bf16 %v159_v49  ;;  %v154_v1 = vld [vmem:[#allocation2 + $0x188] sm:$0xff]  ;;  %v153_v4 = vld [vmem:[#allocation2 + $0x180] sm:$0xff]  ;;  %v202_v15 = vld [vmem:[#allocation10 + $0x3] ss:$4 sm:$0x3] }
  0x70   :  { %217 = vmatpush1.msra.mxu0 %v197_v30  ;;  %v180_v56 = vunpack.c.h.bf16 %v158_v52  ;;  %v179_v57 = vunpack.c.l.bf16 %v158_v52  ;;  %v178_v59 = vunpack.c.h.bf16 %v157_v55  ;;  %v177_v60 = vunpack.c.l.bf16 %v157_v55 }
  0x71   :  { %218 = vmatprep.subr.mxu0 %v196_v32  ;;  %v176_v62 = vunpack.c.h.bf16 %v156_v58  ;;  %v175_v63 = vunpack.c.l.bf16 %v156_v58  ;;  %v174_v2 = vunpack.c.h.bf16 %v155_v61  ;;  %v173_v3 = vunpack.c.l.bf16 %v155_v61 }
  0x72   :  { %219 = vmatpush1.msra.mxu0 %v195_v33  ;;  %v172_v6 = vunpack.c.h.bf16 %v154_v1  ;;  %v171_v7 = vunpack.c.l.bf16 %v154_v1  ;;  %v170_v8 = vunpack.c.h.bf16 %v153_v4  ;;  %v169_v10 = vunpack.c.l.bf16 %v153_v4 }
  0x73   :  { %220 = vmatprep.subr.mxu0 %v194_v35  ;;  %v205_v12 = vshrl.u32 %v204_v11, 7  ;;  %v295_v32 = vmul.f32 %v1308_v5, %v1308_v5 }
  0x74   :  { %221 = vmatpush1.msra.mxu0 %v193_v36 }
  0x75   :  { %222 = vmatprep.subr.mxu0 %v192_v38  ;;  %v1340_v14 = vsub.s32 1, %v205_v12  ;;  %v1343_v19 = vsub.s32 0, %v205_v12  ;;  %v1350_v37 = vmul.f32 1.2500625e-05, %v295_v32 }
  0x76   :  { %223 = vmatpush1.msra.mxu0 %v191_v39 }
  0x77   :  { %224 = vmatprep.subr.mxu0 %v190_v41  ;;  %v211_v16 = vrot.slane %v202_v15, %v1340_v14  ;;  %v207_v25 = vrot.slane %v202_v15, %v1343_v19 }
  0x78   :  { %225 = vmatpush1.msra.mxu0 %v189_v42 }
  0x79   :  { %226 = vmatprep.subr.mxu0 %v188_v44 }
  0x7a   :  { %227 = vmatpush1.msra.mxu0 %v187_v45 }
  0x7b   :  { %228 = vmatprep.subr.mxu0 %v186_v47 }
  0x7c   :  { %229 = vmatpush1.msra.mxu0 %v185_v48 }
  0x7d   :  { %230 = vmatprep.subr.mxu0 %v184_v50 }
  0x7e   :  { %231 = vmatpush1.msra.mxu0 %v183_v51 }
  0x7f   :  { %232 = vmatprep.subr.mxu0 %v182_v53 }
  0x80   :  { %233 = vmatpush1.msra.mxu0 %v181_v54 }
  0x81   :  { %234 = vmatprep.subr.mxu0 %v180_v56 }
  0x82   :  { %235 = vmatpush1.msra.mxu0 %v179_v57 }
  0x83   :  { %236 = vmatprep.subr.mxu0 %v178_v59 }
  0x84   :  { %237 = vmatpush1.msra.mxu0 %v177_v60 }
  0x85   :  { %238 = vmatprep.subr.mxu0 %v176_v62 }
  0x86   :  { %239 = vmatpush1.msra.mxu0 %v175_v63 }
  0x87   :  { %240 = vmatprep.subr.mxu0 %v174_v2 }
  0x88   :  { %241 = vmatpush1.msra.mxu0 %v173_v3 }
  0x89   :  { %242 = vmatprep.subr.mxu0 %v172_v6 }
  0x8a   :  { %243 = vmatpush1.msra.mxu0 %v171_v7 }
  0x8b   :  { %244 = vmatprep.subr.mxu0 %v170_v8 }
  0x8c   :  { %245 = vmatpush1.msra.mxu0 %v169_v10 }
  0x8d   :  { %279 = vmatmul.mubr.f32.vlgmr.msra.gmra.mxu0 %v1320_v9 }
 0x14d   :  { %v280_v18 = vpop.f32.mrf.mxu0 }
 0x14e   :  { %v281_v28 = vadd.f32 %v280_v18, %v207_v25 }
 0x14f   :  { %v282_v21 = vpop.f32.mrf.mxu0 }
 0x150   :  { %v283_v24 = vadd.f32 %v282_v21, %v211_v16  ;;  %v285_v29 = vsub.f32 %v1308_v5, %v281_v28 }
 0x152   :  { %v288_v26 = vsub.f32 0.0, %v283_v24  ;;  %v286_v30 = vmul.f32 0.5, %v285_v29  ;;  %v293_v36 = vmul.f32 0.5, %v283_v24 }
 0x154   :  { %v289_v27 = vmul.f32 1.442695, %v288_v26  ;;  %v287_v31 = vmul.f32 %v286_v30, %v285_v29 }
 0x156   :  { %1027 = vpow2.f32 %v289_v27 }
 0x163   :  { %v1028_v33 = vpop.eup %1027 }
 0x164   :  { %v291_v34 = vmul.f32 %v1028_v33, %v287_v31 }
 0x166   :  { %v292_v35 = vadd.f32 %v291_v34, %v1336_v22 }
 0x168   :  { %v1352_v38 = vadd.f32 %v293_v36, %v292_v35 }
 0x16a   :  { %v297_v39 = vsub.f32 %v1352_v38, %v1350_v37 }
 0x16b   :  { %1218 = dma.done.wait [#allocation4 + $0x2], 2048 }
 0x16c   :  { %1219 = vsyncadd [#allocation4 + $0x2], 4294965248  ;;  %425 = vmatprep.mubr.f32.mxu1 %v1238_v23  ;;  %v315_v40 = vld [vmem:[#allocation2 + $0x178] sm:$0xff]  ;;  %v314_v41 = vld [vmem:[#allocation2 + $0x170] sm:$0xff] }
 0x16d   :  { %v313_v42 = vld [vmem:[#allocation2 + $0x168] sm:$0xff]  ;;  %v347_v43 = vunpack.c.h.bf16 %v315_v40  ;;  %v346_v44 = vunpack.c.l.bf16 %v315_v40  ;;  %v345_v45 = vunpack.c.h.bf16 %v314_v41  ;;  %v344_v46 = vunpack.c.l.bf16 %v314_v41  ;;  %v312_v22 = vld [vmem:[#allocation2 + $0x160] sm:$0xff]  ;;  %v311_v49 = vld [vmem:[#allocation2 + $0x158] sm:$0xff] }
 0x16e   :  { %v343_v47 = vunpack.c.h.bf16 %v313_v42  ;;  %v342_v48 = vunpack.c.l.bf16 %v313_v42  ;;  %v341_v50 = vunpack.c.h.bf16 %v312_v22  ;;  %v340_v51 = vunpack.c.l.bf16 %v312_v22  ;;  %v310_v52 = vld [vmem:[#allocation2 + $0x150] sm:$0xff]  ;;  %v309_v55 = vld [vmem:[#allocation2 + $0x148] sm:$0xff]  ;;  %v308_v58 = vld [vmem:[#allocation2 + $0x140] sm:$0xff] }
 0x16f   :  { %361 = vmatprep.subr.mxu1 %v347_v43  ;;  %v339_v53 = vunpack.c.h.bf16 %v311_v49  ;;  %v338_v54 = vunpack.c.l.bf16 %v311_v49  ;;  %v337_v56 = vunpack.c.h.bf16 %v310_v52  ;;  %v336_v57 = vunpack.c.l.bf16 %v310_v52  ;;  %v307_v61 = vld [vmem:[#allocation2 + $0x138] sm:$0xff]  ;;  %v306_v1 = vld [vmem:[#allocation2 + $0x130] sm:$0xff]  ;;  %v305_v4 = vld [vmem:[#allocation2 + $0x128] sm:$0xff] }
 0x170   :  { %362 = vmatpush1.msra.mxu1 %v346_v44  ;;  %v335_v59 = vunpack.c.h.bf16 %v309_v55  ;;  %v334_v60 = vunpack.c.l.bf16 %v309_v55  ;;  %v333_v62 = vunpack.c.h.bf16 %v308_v58  ;;  %v332_v63 = vunpack.c.l.bf16 %v308_v58  ;;  %v304_v8 = vld [vmem:[#allocation2 + $0x120] sm:$0xff]  ;;  %v303_v12 = vld [vmem:[#allocation2 + $0x118] sm:$0xff]  ;;  %v302_v18 = vld [vmem:[#allocation2 + $0x110] sm:$0xff] }
 0x171   :  { %363 = vmatprep.subr.mxu1 %v345_v45  ;;  %v331_v2 = vunpack.c.h.bf16 %v307_v61  ;;  %v330_v3 = vunpack.c.l.bf16 %v307_v61  ;;  %v329_v6 = vunpack.c.h.bf16 %v306_v1  ;;  %v328_v7 = vunpack.c.l.bf16 %v306_v1  ;;  %v301_v25 = vld [vmem:[#allocation2 + $0x108] sm:$0xff]  ;;  %v300_v28 = vld [vmem:[#allocation2 + $0x100] sm:$0xff]  ;;  %v349_v33 = vld [vmem:[#allocation10 + $0x2] ss:$4 sm:$0x3] }
 0x172   :  { %364 = vmatpush1.msra.mxu1 %v344_v46  ;;  %v327_v10 = vunpack.c.h.bf16 %v305_v4  ;;  %v326_v11 = vunpack.c.l.bf16 %v305_v4  ;;  %v325_v15 = vunpack.c.h.bf16 %v304_v8  ;;  %v324_v16 = vunpack.c.l.bf16 %v304_v8 }
 0x173   :  { %365 = vmatprep.subr.mxu1 %v343_v47  ;;  %v323_v21 = vunpack.c.h.bf16 %v303_v12  ;;  %v322_v24 = vunpack.c.l.bf16 %v303_v12  ;;  %v321_v26 = vunpack.c.h.bf16 %v302_v18  ;;  %v320_v27 = vunpack.c.l.bf16 %v302_v18 }
 0x174   :  { %366 = vmatpush1.msra.mxu1 %v342_v48  ;;  %v319_v29 = vunpack.c.h.bf16 %v301_v25  ;;  %v318_v30 = vunpack.c.l.bf16 %v301_v25  ;;  %v317_v31 = vunpack.c.h.bf16 %v300_v28  ;;  %v316_v32 = vunpack.c.l.bf16 %v300_v28 }
 0x175   :  { %367 = vmatprep.subr.mxu1 %v341_v50  ;;  %v358_v34 = vrot.slane %v349_v33, %v1340_v14  ;;  %v354_v41 = vrot.slane %v349_v33, %v1343_v19  ;;  %v442_v47 = vmul.f32 %v1320_v9, %v1320_v9 }
 0x176   :  { %368 = vmatpush1.msra.mxu1 %v340_v51 }
 0x177   :  { %369 = vmatprep.subr.mxu1 %v339_v53  ;;  %v1366_v52 = vmul.f32 0.0006359898, %v442_v47 }
 0x178   :  { %370 = vmatpush1.msra.mxu1 %v338_v54 }
 0x179   :  { %371 = vmatprep.subr.mxu1 %v337_v56 }
 0x17a   :  { %372 = vmatpush1.msra.mxu1 %v336_v57 }
 0x17b   :  { %373 = vmatprep.subr.mxu1 %v335_v59 }
 0x17c   :  { %374 = vmatpush1.msra.mxu1 %v334_v60 }
 0x17d   :  { %375 = vmatprep.subr.mxu1 %v333_v62 }
 0x17e   :  { %376 = vmatpush1.msra.mxu1 %v332_v63 }
 0x17f   :  { %377 = vmatprep.subr.mxu1 %v331_v2 }
 0x180   :  { %378 = vmatpush1.msra.mxu1 %v330_v3 }
 0x181   :  { %379 = vmatprep.subr.mxu1 %v329_v6 }
 0x182   :  { %380 = vmatpush1.msra.mxu1 %v328_v7 }
 0x183   :  { %381 = vmatprep.subr.mxu1 %v327_v10 }
 0x184   :  { %382 = vmatpush1.msra.mxu1 %v326_v11 }
 0x185   :  { %383 = vmatprep.subr.mxu1 %v325_v15 }
 0x186   :  { %384 = vmatpush1.msra.mxu1 %v324_v16 }
 0x187   :  { %385 = vmatprep.subr.mxu1 %v323_v21 }
 0x188   :  { %386 = vmatpush1.msra.mxu1 %v322_v24 }
 0x189   :  { %387 = vmatprep.subr.mxu1 %v321_v26 }
 0x18a   :  { %388 = vmatpush1.msra.mxu1 %v320_v27 }
 0x18b   :  { %389 = vmatprep.subr.mxu1 %v319_v29 }
 0x18c   :  { %390 = vmatpush1.msra.mxu1 %v318_v30 }
 0x18d   :  { %391 = vmatprep.subr.mxu1 %v317_v31 }
 0x18e   :  { %392 = vmatpush1.msra.mxu1 %v316_v32 }
 0x18f   :  { %426 = vmatmul.mubr.f32.vlgmr.msra.gmra.mxu1 %v1326_v13 }
 0x24f   :  { %v427_v35 = vpop.f32.mrf.mxu1 }
 0x250   :  { %v428_v44 = vadd.f32 %v427_v35, %v354_v41 }
 0x251   :  { %v429_v36 = vpop.f32.mrf.mxu1 }
 0x252   :  { %v430_v40 = vadd.f32 %v429_v36, %v358_v34  ;;  %v432_v45 = vsub.f32 %v1320_v9, %v428_v44 }
 0x254   :  { %v435_v42 = vsub.f32 0.0, %v430_v40  ;;  %v433_v46 = vmul.f32 0.5, %v432_v45  ;;  %v440_v51 = vmul.f32 0.5, %v430_v40 }
 0x256   :  { %v436_v43 = vmul.f32 1.442695, %v435_v42  ;;  %v434_v22 = vmul.f32 %v433_v46, %v432_v45 }
 0x258   :  { %1029 = vpow2.f32 %v436_v43 }
 0x265   :  { %v1030_v48 = vpop.eup %1029 }
 0x266   :  { %v438_v49 = vmul.f32 %v1030_v48, %v434_v22 }
 0x268   :  { %v439_v50 = vadd.f32 %v438_v49, %v297_v39 }
 0x26a   :  { %v1368_v53 = vadd.f32 %v440_v51, %v439_v50 }
 0x26c   :  { %v444_v54 = vsub.f32 %v1368_v53, %v1366_v52 }
 0x26d   :  { %1220 = dma.done.wait [#allocation4 + $0x1], 2048 }
 0x26e   :  { %1221 = vsyncadd [#allocation4 + $0x1], 4294965248  ;;  %572 = vmatprep.mubr.f32.mxu0 %v1238_v23  ;;  %v462_v55 = vld [vmem:[#allocation2 + $0xf8] sm:$0xff]  ;;  %v461_v9 = vld [vmem:[#allocation2 + $0xf0] sm:$0xff] }
 0x26f   :  { %v460_v56 = vld [vmem:[#allocation2 + $0xe8] sm:$0xff]  ;;  %v494_v57 = vunpack.c.h.bf16 %v462_v55  ;;  %v493_v58 = vunpack.c.l.bf16 %v462_v55  ;;  %v492_v59 = vunpack.c.h.bf16 %v461_v9  ;;  %v491_v37 = vunpack.c.l.bf16 %v461_v9  ;;  %v459_v38 = vld [vmem:[#allocation2 + $0xe0] sm:$0xff]  ;;  %v458_v61 = vld [vmem:[#allocation2 + $0xd8] sm:$0xff] }
 0x270   :  { %v490_v39 = vunpack.c.h.bf16 %v460_v56  ;;  %v489_v60 = vunpack.c.l.bf16 %v460_v56  ;;  %v488_v62 = vunpack.c.h.bf16 %v459_v38  ;;  %v487_v63 = vunpack.c.l.bf16 %v459_v38  ;;  %v457_v1 = vld [vmem:[#allocation2 + $0xd0] sm:$0xff]  ;;  %v456_v4 = vld [vmem:[#allocation2 + $0xc8] sm:$0xff]  ;;  %v455_v8 = vld [vmem:[#allocation2 + $0xc0] sm:$0xff] }
 0x271   :  { %508 = vmatprep.subr.mxu0 %v494_v57  ;;  %v486_v2 = vunpack.c.h.bf16 %v458_v61  ;;  %v485_v3 = vunpack.c.l.bf16 %v458_v61  ;;  %v484_v6 = vunpack.c.h.bf16 %v457_v1  ;;  %v483_v7 = vunpack.c.l.bf16 %v457_v1  ;;  %v454_v12 = vld [vmem:[#allocation2 + $0xb8] sm:$0xff]  ;;  %v453_v18 = vld [vmem:[#allocation2 + $0xb0] sm:$0xff]  ;;  %v452_v25 = vld [vmem:[#allocation2 + $0xa8] sm:$0xff] }
 0x272   :  { %509 = vmatpush1.msra.mxu0 %v493_v58  ;;  %v482_v10 = vunpack.c.h.bf16 %v456_v4  ;;  %v481_v11 = vunpack.c.l.bf16 %v456_v4  ;;  %v480_v15 = vunpack.c.h.bf16 %v455_v8  ;;  %v479_v16 = vunpack.c.l.bf16 %v455_v8  ;;  %v451_v28 = vld [vmem:[#allocation2 + $0xa0] sm:$0xff]  ;;  %v450_v31 = vld [vmem:[#allocation2 + $0x98] sm:$0xff]  ;;  %v449_v34 = vld [vmem:[#allocation2 + $0x90] sm:$0xff] }
 0x273   :  { %510 = vmatprep.subr.mxu0 %v492_v59  ;;  %v478_v21 = vunpack.c.h.bf16 %v454_v12  ;;  %v477_v24 = vunpack.c.l.bf16 %v454_v12  ;;  %v476_v26 = vunpack.c.h.bf16 %v453_v18  ;;  %v475_v27 = vunpack.c.l.bf16 %v453_v18  ;;  %v448_v40 = vld [vmem:[#allocation2 + $0x88] sm:$0xff]  ;;  %v447_v43 = vld [vmem:[#allocation2 + $0x80] sm:$0xff]  ;;  %v496_v47 = vld [vmem:[#allocation10 + $0x1] ss:$4 sm:$0x3] }
 0x274   :  { %511 = vmatpush1.msra.mxu0 %v491_v37  ;;  %v474_v29 = vunpack.c.h.bf16 %v452_v25  ;;  %v473_v30 = vunpack.c.l.bf16 %v452_v25  ;;  %v472_v32 = vunpack.c.h.bf16 %v451_v28  ;;  %v471_v33 = vunpack.c.l.bf16 %v451_v28 }
 0x275   :  { %512 = vmatprep.subr.mxu0 %v490_v39  ;;  %v470_v35 = vunpack.c.h.bf16 %v450_v31  ;;  %v469_v36 = vunpack.c.l.bf16 %v450_v31  ;;  %v468_v41 = vunpack.c.h.bf16 %v449_v34  ;;  %v467_v42 = vunpack.c.l.bf16 %v449_v34 }
 0x276   :  { %513 = vmatpush1.msra.mxu0 %v489_v60  ;;  %v466_v44 = vunpack.c.h.bf16 %v448_v40  ;;  %v465_v45 = vunpack.c.l.bf16 %v448_v40  ;;  %v464_v46 = vunpack.c.h.bf16 %v447_v43  ;;  %v463_v22 = vunpack.c.l.bf16 %v447_v43 }
 0x277   :  { %514 = vmatprep.subr.mxu0 %v488_v62  ;;  %v505_v48 = vrot.slane %v496_v47, %v1340_v14  ;;  %v501_v55 = vrot.slane %v496_v47, %v1343_v19  ;;  %v589_v38 = vmul.f32 %v1326_v13, %v1326_v13 }
 0x278   :  { %515 = vmatpush1.msra.mxu0 %v487_v63 }
 0x279   :  { %516 = vmatprep.subr.mxu0 %v486_v2  ;;  %v1382_v63 = vmul.f32 0.0012626026, %v589_v38 }
 0x27a   :  { %517 = vmatpush1.msra.mxu0 %v485_v3 }
 0x27b   :  { %518 = vmatprep.subr.mxu0 %v484_v6 }
 0x27c   :  { %519 = vmatpush1.msra.mxu0 %v483_v7 }
 0x27d   :  { %520 = vmatprep.subr.mxu0 %v482_v10 }
 0x27e   :  { %521 = vmatpush1.msra.mxu0 %v481_v11 }
 0x27f   :  { %522 = vmatprep.subr.mxu0 %v480_v15 }
 0x280   :  { %523 = vmatpush1.msra.mxu0 %v479_v16 }
 0x281   :  { %524 = vmatprep.subr.mxu0 %v478_v21 }
 0x282   :  { %525 = vmatpush1.msra.mxu0 %v477_v24 }
 0x283   :  { %526 = vmatprep.subr.mxu0 %v476_v26 }
 0x284   :  { %527 = vmatpush1.msra.mxu0 %v475_v27 }
 0x285   :  { %528 = vmatprep.subr.mxu0 %v474_v29 }
 0x286   :  { %529 = vmatpush1.msra.mxu0 %v473_v30 }
 0x287   :  { %530 = vmatprep.subr.mxu0 %v472_v32 }
 0x288   :  { %531 = vmatpush1.msra.mxu0 %v471_v33 }
 0x289   :  { %532 = vmatprep.subr.mxu0 %v470_v35 }
 0x28a   :  { %533 = vmatpush1.msra.mxu0 %v469_v36 }
 0x28b   :  { %534 = vmatprep.subr.mxu0 %v468_v41 }
 0x28c   :  { %535 = vmatpush1.msra.mxu0 %v467_v42 }
 0x28d   :  { %536 = vmatprep.subr.mxu0 %v466_v44 }
 0x28e   :  { %537 = vmatpush1.msra.mxu0 %v465_v45 }
 0x28f   :  { %538 = vmatprep.subr.mxu0 %v464_v46 }
 0x290   :  { %539 = vmatpush1.msra.mxu0 %v463_v22 }
 0x291   :  { %573 = vmatmul.mubr.f32.vlgmr.msra.gmra.mxu0 %v1329_v17 }
 0x351   :  { %v574_v49 = vpop.f32.mrf.mxu0 }
 0x352   :  { %v575_v57 = vadd.f32 %v574_v49, %v501_v55 }
 0x353   :  { %v576_v50 = vpop.f32.mrf.mxu0 }
 0x354   :  { %v577_v51 = vadd.f32 %v576_v50, %v505_v48  ;;  %v579_v58 = vsub.f32 %v1326_v13, %v575_v57 }
 0x356   :  { %v582_v9 = vsub.f32 0.0, %v577_v51  ;;  %v580_v59 = vmul.f32 0.5, %v579_v58  ;;  %v587_v62 = vmul.f32 0.5, %v577_v51 }
 0x358   :  { %v583_v56 = vmul.f32 1.442695, %v582_v9  ;;  %v581_v37 = vmul.f32 %v580_v59, %v579_v58 }
 0x35a   :  { %1031 = vpow2.f32 %v583_v56 }
 0x367   :  { %v1032_v39 = vpop.eup %1031 }
 0x368   :  { %v585_v60 = vmul.f32 %v1032_v39, %v581_v37 }
 0x36a   :  { %v586_v61 = vadd.f32 %v585_v60, %v444_v54 }
 0x36c   :  { %v1384_v1 = vadd.f32 %v587_v62, %v586_v61 }
 0x36e   :  { %v591_v2 = vsub.f32 %v1384_v1, %v1382_v63 }
 0x36f   :  { %1222 = dma.done.wait [#allocation4], 2048 }
 0x370   :  { %1223 = vsyncadd [#allocation4], 4294965248  ;;  %718 = vmatprep.mubr.f32.mxu1 %v1238_v23  ;;  %v609_v3 = vld [vmem:[#allocation2 + $0x78] sm:$0xff]  ;;  %v608_v13 = vld [vmem:[#allocation2 + $0x70] sm:$0xff] }
 0x371   :  { %v607_v4 = vld [vmem:[#allocation2 + $0x68] sm:$0xff]  ;;  %v641_v6 = vunpack.c.h.bf16 %v609_v3  ;;  %v640_v7 = vunpack.c.l.bf16 %v609_v3  ;;  %v639_v8 = vunpack.c.h.bf16 %v608_v13  ;;  %v638_v52 = vunpack.c.l.bf16 %v608_v13  ;;  %v606_v53 = vld [vmem:[#allocation2 + $0x60] sm:$0xff]  ;;  %v605_v11 = vld [vmem:[#allocation2 + $0x58] sm:$0xff] }
 0x372   :  { %v637_v54 = vunpack.c.h.bf16 %v607_v4  ;;  %v636_v10 = vunpack.c.l.bf16 %v607_v4  ;;  %v635_v12 = vunpack.c.h.bf16 %v606_v53  ;;  %v634_v15 = vunpack.c.l.bf16 %v606_v53  ;;  %v604_v16 = vld [vmem:[#allocation2 + $0x50] sm:$0xff]  ;;  %v603_v24 = vld [vmem:[#allocation2 + $0x48] sm:$0xff]  ;;  %v602_v27 = vld [vmem:[#allocation2 + $0x40] sm:$0xff] }
 0x373   :  { %654 = vmatprep.subr.mxu1 %v641_v6  ;;  %v633_v18 = vunpack.c.h.bf16 %v605_v11  ;;  %v632_v21 = vunpack.c.l.bf16 %v605_v11  ;;  %v631_v25 = vunpack.c.h.bf16 %v604_v16  ;;  %v630_v26 = vunpack.c.l.bf16 %v604_v16  ;;  %v601_v30 = vld [vmem:[#allocation2 + $0x38] sm:$0xff]  ;;  %v600_v33 = vld [vmem:[#allocation2 + $0x30] sm:$0xff]  ;;  %v599_v36 = vld [vmem:[#allocation2 + $0x28] sm:$0xff] }
 0x374   :  { %655 = vmatpush1.msra.mxu1 %v640_v7  ;;  %v629_v28 = vunpack.c.h.bf16 %v603_v24  ;;  %v628_v29 = vunpack.c.l.bf16 %v603_v24  ;;  %v627_v31 = vunpack.c.h.bf16 %v602_v27  ;;  %v626_v32 = vunpack.c.l.bf16 %v602_v27  ;;  %v598_v42 = vld [vmem:[#allocation2 + $0x20] sm:$0xff]  ;;  %v597_v45 = vld [vmem:[#allocation2 + $0x18] sm:$0xff]  ;;  %v596_v47 = vld [vmem:[#allocation2 + $0x10] sm:$0xff] }
 0x375   :  { %656 = vmatprep.subr.mxu1 %v639_v8  ;;  %v625_v34 = vunpack.c.h.bf16 %v601_v30  ;;  %v624_v35 = vunpack.c.l.bf16 %v601_v30  ;;  %v623_v40 = vunpack.c.h.bf16 %v600_v33  ;;  %v622_v41 = vunpack.c.l.bf16 %v600_v33  ;;  %v595_v50 = vld [vmem:[#allocation2 + $0x8] sm:$0xff]  ;;  %v594_v9 = vld [vmem:[#allocation2] sm:$0xff]  ;;  %v642_v37 = vld [vmem:[#allocation10] ss:$4 sm:$0x3] }
 0x376   :  { %657 = vmatpush1.msra.mxu1 %v638_v52  ;;  %v621_v43 = vunpack.c.h.bf16 %v599_v36  ;;  %v620_v44 = vunpack.c.l.bf16 %v599_v36  ;;  %v619_v46 = vunpack.c.h.bf16 %v598_v42  ;;  %v618_v22 = vunpack.c.l.bf16 %v598_v42 }
 0x377   :  { %658 = vmatprep.subr.mxu1 %v637_v54  ;;  %v617_v48 = vunpack.c.h.bf16 %v597_v45  ;;  %v616_v49 = vunpack.c.l.bf16 %v597_v45  ;;  %v615_v51 = vunpack.c.h.bf16 %v596_v47  ;;  %v614_v55 = vunpack.c.l.bf16 %v596_v47 }
 0x378   :  { %659 = vmatpush1.msra.mxu1 %v636_v10  ;;  %v613_v56 = vunpack.c.h.bf16 %v595_v50  ;;  %v612_v57 = vunpack.c.l.bf16 %v595_v50  ;;  %v611_v58 = vunpack.c.h.bf16 %v594_v9  ;;  %v610_v59 = vunpack.c.l.bf16 %v594_v9 }
 0x379   :  { %660 = vmatprep.subr.mxu1 %v635_v12  ;;  %v651_v38 = vrot.slane %v642_v37, %v1340_v14  ;;  %v647_v62 = vrot.slane %v642_v37, %v1343_v19  ;;  %v735_v52 = vmul.f32 %v1329_v17, %v1329_v17 }
 0x37a   :  { %661 = vmatpush1.msra.mxu1 %v634_v15 }
 0x37b   :  { %662 = vmatprep.subr.mxu1 %v633_v18  ;;  %v1398_v10 = vmul.f32 0.0018923683, %v735_v52 }
 0x37c   :  { %663 = vmatpush1.msra.mxu1 %v632_v21 }
 0x37d   :  { %664 = vmatprep.subr.mxu1 %v631_v25 }
 0x37e   :  { %665 = vmatpush1.msra.mxu1 %v630_v26 }
 0x37f   :  { %666 = vmatprep.subr.mxu1 %v629_v28 }
 0x380   :  { %667 = vmatpush1.msra.mxu1 %v628_v29 }
 0x381   :  { %668 = vmatprep.subr.mxu1 %v627_v31 }
 0x382   :  { %669 = vmatpush1.msra.mxu1 %v626_v32 }
 0x383   :  { %670 = vmatprep.subr.mxu1 %v625_v34 }
 0x384   :  { %671 = vmatpush1.msra.mxu1 %v624_v35 }
 0x385   :  { %672 = vmatprep.subr.mxu1 %v623_v40 }
 0x386   :  { %673 = vmatpush1.msra.mxu1 %v622_v41 }
 0x387   :  { %674 = vmatprep.subr.mxu1 %v621_v43 }
 0x388   :  { %675 = vmatpush1.msra.mxu1 %v620_v44 }
 0x389   :  { %676 = vmatprep.subr.mxu1 %v619_v46 }
 0x38a   :  { %677 = vmatpush1.msra.mxu1 %v618_v22 }
 0x38b   :  { %678 = vmatprep.subr.mxu1 %v617_v48 }
 0x38c   :  { %679 = vmatpush1.msra.mxu1 %v616_v49 }
 0x38d   :  { %680 = vmatprep.subr.mxu1 %v615_v51 }
 0x38e   :  { %681 = vmatpush1.msra.mxu1 %v614_v55 }
 0x38f   :  { %682 = vmatprep.subr.mxu1 %v613_v56 }
 0x390   :  { %683 = vmatpush1.msra.mxu1 %v612_v57 }
 0x391   :  { %684 = vmatprep.subr.mxu1 %v611_v58 }
 0x392   :  { %685 = vmatpush1.msra.mxu1 %v610_v59 }
 0x393   :  { %719 = vmatmul.mubr.f32.vlgmr.msra.gmra.mxu1 %v1332_v20 }
 0x453   :  { %v720_v39 = vpop.f32.mrf.mxu1 }
 0x454   :  { %v721_v4 = vadd.f32 %v720_v39, %v647_v62 }
 0x455   :  { %v722_v60 = vpop.f32.mrf.mxu1 }
 0x456   :  { %v723_v61 = vadd.f32 %v722_v60, %v651_v38  ;;  %v725_v6 = vsub.f32 %v1329_v17, %v721_v4 }
 0x458   :  { %v728_v3 = vsub.f32 0.0, %v723_v61  ;;  %v726_v7 = vmul.f32 0.5, %v725_v6  ;;  %v733_v54 = vmul.f32 0.5, %v723_v61 }
 0x45a   :  { %v729_v13 = vmul.f32 1.442695, %v728_v3  ;;  %v727_v8 = vmul.f32 %v726_v7, %v725_v6 }
 0x45c   :  { %1033 = vpow2.f32 %v729_v13 }
 0x469   :  { %v1034_v20 = vpop.eup %1033 }
 0x46a   :  { %v731_v53 = vmul.f32 %v1034_v20, %v727_v8 }
 0x46c   :  { %v732_v14 = vadd.f32 %v731_v53, %v591_v2 }
 0x46e   :  { %v1400_v19 = vadd.f32 %v733_v54, %v732_v14 }
 0x470   :  { %v737_v11 = vsub.f32 %v1400_v19, %v1398_v10 }
 0x471   :  { %1224 = dma.done.wait [#allocation4 + $0x4], 1024 }
 0x472   :  { %1225 = vsyncadd [#allocation4 + $0x4], 4294966272  ;;  %977 = vmatprep.subr.mxu0 %v1238_v23  ;;  %vm1239_vm0 = vmmov 0   ;;  %v959_v17 = vld [vmem:[#allocation3 + $0x38] sm:$0xff]   ;;  %v958_v12 = vld [vmem:[#allocation3 + $0x30] sm:$0xff]   ;;  %s1240_s15 = smov [#allocation11]  }
 0x473   :  { %1009 = vmatprep.mubr.msk.f32.mxu0 %vm1239_vm0, %v1238_v23  ;;  %v951_v15 = vunpack.c.l.bf16 %v959_v17  ;;  %v952_v63 = vunpack.c.h.bf16 %v959_v17  ;;  %v948_v1 = vunpack.c.h.bf16 %v958_v12  ;;  %v957_v2 = vld [vmem:[#allocation3 + $0x28] sm:$0xff]   ;;  %v947_v16 = vunpack.c.l.bf16 %v958_v12  ;;  %v956_v21 = vld [vmem:[#allocation3 + $0x20] sm:$0xff]   ;;  %v955_v26 = vld [vmem:[#allocation3 + $0x18] sm:$0xff]  }
 0x474   :  { %v944_v18 = vunpack.c.h.bf16 %v957_v2  ;;  %v943_v24 = vunpack.c.l.bf16 %v957_v2  ;;  %v940_v25 = vunpack.c.h.bf16 %v956_v21  ;;  %v939_v27 = vunpack.c.l.bf16 %v956_v21  ;;  %v954_v29 = vld [vmem:[#allocation3 + $0x10] sm:$0xff]   ;;  %v953_v32 = vld [vmem:[#allocation3 + $0x8] sm:$0xff]   ;;  %v922_v35 = vld [vmem:[#allocation3] sm:$0xff]  }
 0x475   :  { %978 = vmatpush3.msra.mxu0 %v952_v63  ;;  %v936_v28 = vunpack.c.h.bf16 %v955_v26  ;;  %v935_v30 = vunpack.c.l.bf16 %v955_v26  ;;  %v932_v31 = vunpack.c.h.bf16 %v954_v29  ;;  %v931_v33 = vunpack.c.l.bf16 %v954_v29  ;;  %v915_v42 = vld [vmem:[%s1435_s3] ss:$0 sm:$0xff] }
 0x476   :  { %979 = vmatprep.subr.mxu0 %v1238_v23  ;;  %v928_v34 = vunpack.c.h.bf16 %v953_v32  ;;  %v927_v36 = vunpack.c.l.bf16 %v953_v32  ;;  %v924_v40 = vunpack.c.h.bf16 %v922_v35  ;;  %v923_v41 = vunpack.c.l.bf16 %v922_v35 }
 0x477   :  { %980 = vmatpush3.msra.mxu0 %v951_v15 }
 0x478   :  { %981 = vmatprep.subr.mxu0 %v1238_v23 }
 0x479   :  { %982 = vmatpush3.msra.mxu0 %v948_v1 }
 0x47a   :  { %983 = vmatprep.subr.mxu0 %v1238_v23 }
 0x47b   :  { %984 = vmatpush3.msra.mxu0 %v947_v16 }
 0x47c   :  { %985 = vmatprep.subr.mxu0 %v1238_v23 }
 0x47d   :  { %986 = vmatpush3.msra.mxu0 %v944_v18 }
 0x47e   :  { %987 = vmatprep.subr.mxu0 %v1238_v23 }
 0x47f   :  { %988 = vmatpush3.msra.mxu0 %v943_v24 }
 0x480   :  { %989 = vmatprep.subr.mxu0 %v1238_v23 }
 0x481   :  { %990 = vmatpush3.msra.mxu0 %v940_v25 }
 0x482   :  { %991 = vmatprep.subr.mxu0 %v1238_v23 }
 0x483   :  { %992 = vmatpush3.msra.mxu0 %v939_v27 }
 0x484   :  { %993 = vmatprep.subr.mxu0 %v1238_v23 }
 0x485   :  { %994 = vmatpush3.msra.mxu0 %v936_v28 }
 0x486   :  { %995 = vmatprep.subr.mxu0 %v1238_v23 }
 0x487   :  { %996 = vmatpush3.msra.mxu0 %v935_v30 }
 0x488   :  { %997 = vmatprep.subr.mxu0 %v1238_v23 }
 0x489   :  { %998 = vmatpush3.msra.mxu0 %v932_v31 }
 0x48a   :  { %999 = vmatprep.subr.mxu0 %v1238_v23 }
 0x48b   :  { %1000 = vmatpush3.msra.mxu0 %v931_v33 }
 0x48c   :  { %1001 = vmatprep.subr.mxu0 %v1238_v23 }
 0x48d   :  { %1002 = vmatpush3.msra.mxu0 %v928_v34 }
 0x48e   :  { %1003 = vmatprep.subr.mxu0 %v1238_v23 }
 0x48f   :  { %1004 = vmatpush3.msra.mxu0 %v927_v36 }
 0x490   :  { %1005 = vmatprep.subr.mxu0 %v1238_v23 }
 0x491   :  { %1006 = vmatpush3.msra.mxu0 %v924_v40 }
 0x492   :  { %1007 = vmatprep.subr.mxu0 %v1238_v23 }
 0x493   :  { %1008 = vmatpush3.msra.mxu0 %v923_v41 }
 0x494   :  { %1010 = vmatmul.mubr.f32.vlgmr.msra.gmra.mxu0 %v1308_v5 }
 0x554   :  { %v846_v43 = vpop.f32.mrf.mxu0 }
 0x555   :  { %v847_v44 = vadd.f32 %v915_v42, %v846_v43 }
 0x556   :  { %v1011_v45 = vpop.f32.mrf.mxu0 }
 0x557   :  { %v850_v46 = vsub.f32 %v1303_v0, %v847_v44 }
 0x559   :  { %v851_v22 = vmul.f32 %v850_v46, %v850_v46 }
 0x55b   :  { %v852_v47 = vmul.f32 0.0625, %v851_v22 }
 0x55d   :  { %v853_v48 = vadd.f32 %v852_v47, %v737_v11 }
 0x55f   :  { %854 = vadd.xlane.f32.xlu0 %v853_v48 }
 0x5e8   :  { %v855_v23 = vpop.xlane.xlu0 %854 }
 0x5e9   :  { %v856_v49 = vrot.slane %v855_v23, 4 }
 0x5eb   :  { %v857_v50 = vadd.f32 %v856_v49, %v855_v23 }
 0x5ed   :  { %v858_v5 = vrot.slane %v857_v50, 2 }
 0x5ef   :  { %v859_v51 = vadd.f32 %v858_v5, %v857_v50 }
 0x5f1   :  { %v860_v55 = vrot.slane %v859_v51, 1 }
 0x5f3   :  { %v861_v9 = vadd.f32 %v860_v55, %v859_v51 }
 0x5f5   :  { %1012 = vpush %v861_v9 }
 0x626   :  { %s1013_s3 = spop %1012 }
 0x627   :  { %s863_s0 = sadd.f32 14046.08, %s1013_s3 }
 0x629   :  { %865 = sst [smem:[#allocation11]] %s863_s0 }
 0x62a   :  { %873 = dma.smem_to_hbm %s1240_s15, 16, %s1438_s6, [#allocation7]  }
 0x62b   :  { %1226 = dma.done.wait [#allocation7], 16  }
 0x62c   :  { %1227 = vsyncadd [#allocation7], 4294967280 }
 0x62d   :  { %877 = sfence }
 0x62e   :  { %878 = vsyncpa [#allocation6], 1 }
 0x62f   :  { %879 = vsyncpa [#allocation9], 1 }
 0x630   :  { %880 = vsyncpa [#allocation7], 1 }
 0x631   :  { %881 = vsyncmov [#allocation4] }
 0x634   :  { %s882_s18 = vpop.sfrf %881 }
 0x635   :  { %p916_p12 = scmp.ne.s32.totalorder %s882_s18, 0 }
 0x637   :  { %886 = shalt.err (%p916_p12)  }
 0x638   :  { %888 = vsyncmov [#allocation4 + $0x1] }
 0x63b   :  { %s889_s19 = vpop.sfrf %888 }
 0x63c   :  { %p917_p13 = scmp.ne.s32.totalorder %s889_s19, 0 }
 0x63e   :  { %893 = shalt.err (%p917_p13)  }
 0x63f   :  { %895 = vsyncmov [#allocation4 + $0x2] }
 0x642   :  { %s896_s20 = vpop.sfrf %895 }
 0x643   :  { %p918_p0 = scmp.ne.s32.totalorder %s896_s20, 0 }
 0x645   :  { %900 = shalt.err (%p918_p0)  }
 0x646   :  { %902 = vsyncmov [#allocation4 + $0x3] }
 0x649   :  { %s903_s6 = vpop.sfrf %902 }
 0x64a   :  { %p919_p1 = scmp.ne.s32.totalorder %s903_s6, 0 }
 0x64c   :  { %907 = shalt.err (%p919_p1)  }
 0x64d   :  { %909 = vsyncmov [#allocation4 + $0x4] }
 0x650   :  { %s910_s21 = vpop.sfrf %909 }
 0x651   :  { %p920_p2 = scmp.ne.s32.totalorder %s910_s21, 0 }
 0x653   :  { %914 = shalt.err (%p920_p2)  }

</bundles_post_ra>
